<compile_context>
chip_gen: v7x
topology: tpu7x:2x2x1
jax: 0.10.0
libtpu: 0.0.40
codegen_flags: <defaults>
</compile_context>

<pallas_src>
import functools
import math

import jax
import jax.numpy as jnp
from jax import lax
from jax.experimental import pallas as pl
from jax.experimental.pallas import tpu as pltpu


_SQRT_2_OVER_PI = math.sqrt(2.0 / math.pi)


def _gelu_tanh(v):
    # TODO(synk): nn.GELU() defaults to the exact erf GELU; the tanh
    # approximation is used because lax.erf lowering in Mosaic is not
    # guaranteed (difference is ~1e-3 relative).
    return 0.5 * v * (1.0 + jnp.tanh(_SQRT_2_OVER_PI * (v + 0.044715 * v * v * v)))


def _gn_stats(v):
    """Mean / (biased) variance over the whole 2-D tile, keepdims -> (1, 1)."""
    m = jnp.mean(jnp.mean(v, axis=1, keepdims=True), axis=0, keepdims=True)
    var = jnp.mean(jnp.mean(jnp.square(v - m), axis=1, keepdims=True),
                   axis=0, keepdims=True)
    return m, var


def _dconv_kernel(x_ref, w1_ref, w2_ref, vec_ref, out_ref, *,
                  dilations, kernel_size, hidden, eps):
    """All `depth` _DConv residual layers, fused, for one batch sample.

    x_ref   : VMEM f32[1, C, T]             input sample (stays resident)
    w1_ref  : VMEM f32[depth, K*hidden, C]  stacked dilated-conv taps
    w2_ref  : VMEM f32[depth, 2C, hidden]   1x1 conv weights
    vec_ref : VMEM f32[depth, 2C, 8]        packed per-channel vectors
              (cols: b1, g1, be1, b2, g2, be2, layer_scale, unused)
    out_ref : VMEM f32[1, C, T]             x after all residual layers
    """
    x = x_ref[0]                                     # (C, T)
    C, T = x.shape
    K = kernel_size
    # (1, T) time index, built once, broadcast for edge masking.
    t_idx = lax.broadcasted_iota(jnp.int32, (1, T), 1)

    for d, dilation in enumerate(dilations):
        # ---- dilated conv1d (C -> hidden, 'same' zero padding) -------------
        # out[:, t] = sum_k W_k @ x[:, t + (k - K//2)*dilation]  (zero outside)
        # Single MXU push for all taps, then per-tap lane roll + edge mask.
        y_all = jnp.dot(w1_ref[d], x, preferred_element_type=jnp.float32)
        center = K // 2
        h = y_all[center * hidden:(center + 1) * hidden, :]
        for k in range(K):
            if k == center:
                continue
            s = (k - center) * dilation              # source time offset
            y = y_all[k * hidden:(k + 1) * hidden, :]
            y = pltpu.roll(y, shift=(-s) % T, axis=1)      # y[:, t] <- y[:, t+s]
            valid = jnp.logical_and(t_idx + s >= 0, t_idx + s < T)
            h = h + y * valid.astype(jnp.float32)

        b1 = vec_ref[d, :hidden, 0:1]
        g1 = vec_ref[d, :hidden, 1:2]
        be1 = vec_ref[d, :hidden, 2:3]
        h = h + b1                                   # (hidden, 1) broadcast

        # ---- GroupNorm(1, hidden) + GELU ----
        m1, v1 = _gn_stats(h)
        h = (h - m1) * lax.rsqrt(v1 + eps) * g1 + be1
        h = _gelu_tanh(h)

        # ---- 1x1 conv (hidden -> 2C) + GroupNorm(1, 2C) ----
        b2 = vec_ref[d, :, 3:4]
        g2 = vec_ref[d, :, 4:5]
        be2 = vec_ref[d, :, 5:6]
        z = jnp.dot(w2_ref[d], h, preferred_element_type=jnp.float32) + b2
        m2, v2 = _gn_stats(z)
        z = (z - m2) * lax.rsqrt(v2 + eps) * g2 + be2

        # ---- GLU + LayerScale + residual (x stays VMEM-resident) ----
        ls = vec_ref[d, :C, 6:7]
        glu = z[:C, :] * jax.nn.sigmoid(z[C:, :])
        x = x + ls * glu

    out_ref[0] = x                                   # single lane-dense store


def _pack_dconv_params(layer_params):
    """Pack per-layer params for the fused kernel.

    Returns:
      w1s  : (depth, K*hidden, C)  rows [k*hidden:(k+1)*hidden] = tap-k weight
      w2s  : (depth, 2C, hidden)
      vecs : (depth, 2C, 8) per-channel vectors, zero-padded,
             cols = [b1, g1, be1, b2, g2, be2, layer_scale, 0].
    """
    hidden, C, K = layer_params[0][0].shape
    w1_l, w2_l, vec_l = [], [], []
    for (w1, b1, g1, be1, w2, b2, g2, be2, ls) in layer_params:
        w1_l.append(jnp.transpose(w1, (2, 0, 1)).reshape(K * hidden, C))
        w2_l.append(w2[:, :, 0])
        v = jnp.zeros((2 * C, 8), jnp.float32)
        v = v.at[:hidden, 0].set(b1).at[:hidden, 1].set(g1).at[:hidden, 2].set(be1)
        v = v.at[:, 3].set(b2).at[:, 4].set(g2).at[:, 5].set(be2)
        v = v.at[:C, 6].set(ls)
        vec_l.append(v)
    return jnp.stack(w1_l), jnp.stack(w2_l), jnp.stack(vec_l)


def dconv_forward(x, layer_params, eps=1e-5):
    """_DConv.forward: x = x + layer(x) for each residual layer (all fused)."""
    B, C, T = x.shape
    depth = len(layer_params)
    hidden, _, K = layer_params[0][0].shape
    dilations = tuple(2 ** d for d in range(depth))      # depth > 0 -> dilate
    for dil in dilations:
        # pltpu.roll wraps columns before masking; only valid while shift < T.
        assert dil * (K // 2) < T, "dilation*(kernel_size//2) must be < T"

    w1s, w2s, vecs = _pack_dconv_params(layer_params)

    kernel = functools.partial(_dconv_kernel, dilations=dilations,
                               kernel_size=K, hidden=hidden, eps=eps)

    matmul_flops = 2 * B * depth * T * (K * hidden * C + 2 * C * hidden)
    ew_flops = B * depth * T * (30 * C + 20 * hidden)
    cost = pl.CostEstimate(
        flops=matmul_flops + ew_flops,
        transcendentals=B * depth * T * (hidden + C),
        bytes_accessed=4 * (2 * B * C * T
                            + int(w1s.size) + int(w2s.size) + int(vecs.size)),
    )

    const3 = lambda b: (0, 0, 0)
    return pl.pallas_call(
        kernel,
        out_shape=jax.ShapeDtypeStruct((B, C, T), jnp.float32),
        grid_spec=pltpu.PrefetchScalarGridSpec(
            num_scalar_prefetch=0,
            grid=(B,),
            in_specs=[
                pl.BlockSpec((1, C, T), lambda b: (b, 0, 0)),      # x
                pl.BlockSpec((depth, K * hidden, C), const3),      # stacked conv1 taps
                pl.BlockSpec((depth, 2 * C, hidden), const3),      # 1x1 conv weights
                pl.BlockSpec((depth, 2 * C, 8), const3),           # packed per-chan vectors
            ],
            out_specs=pl.BlockSpec((1, C, T), lambda b: (b, 0, 0)),
        ),
        compiler_params=pltpu.CompilerParams(
            dimension_semantics=("parallel",),
            vmem_limit_bytes=32 * 1024 * 1024,
        ),
        input_output_aliases={0: 0},        # residual update is in-place
        cost_estimate=cost,
    )(x, w1s, w2s, vecs)


# --------------------------- parameters / reference ---------------------------

def make_dconv_params(key, channels, compress=4, depth=2, kernel_size=3):
    """Deterministic random ("as-if-trained") params in PyTorch layouts:
    conv1 weight (hidden, C, K), conv2 weight (2C, hidden, 1), 1-D vectors."""
    hidden = int(channels / compress)
    layers = []
    for _ in range(depth):
        key, *ks = jax.random.split(key, 10)
        w1 = 0.2 * jax.random.normal(ks[0], (hidden, channels, kernel_size), jnp.float32)
        b1 = 0.1 * jax.random.normal(ks[1], (hidden,), jnp.float32)
        g1 = 1.0 + 0.1 * jax.random.normal(ks[2], (hidden,), jnp.float32)
        be1 = 0.1 * jax.random.normal(ks[3], (hidden,), jnp.float32)
        w2 = 0.2 * jax.random.normal(ks[4], (2 * channels, hidden, 1), jnp.float32)
        b2 = 0.1 * jax.random.normal(ks[5], (2 * channels,), jnp.float32)
        g2 = 1.0 + 0.1 * jax.random.normal(ks[6], (2 * channels,), jnp.float32)
        be2 = 0.1 * jax.random.normal(ks[7], (2 * channels,), jnp.float32)
        # _LayerScale is initialised to `init` (1e-4); random values stand in
        # for a trained state so the numerical check is non-trivial.
        ls = 0.1 * jax.random.normal(ks[8], (channels,), jnp.float32)
        layers.append((w1, b1, g1, be1, w2, b2, g2, be2, ls))
    return layers


def _ref_dconv_layer(x, params, dilation, eps=1e-5):
    w1, b1, g1, be1, w2, b2, g2, be2, ls = params
    B, C, T = x.shape
    hidden, _, K = w1.shape
    pad = dilation * (K // 2)
    hp = jax.lax.Precision.HIGHEST
    xp = jnp.pad(x, ((0, 0), (0, 0), (pad, pad)))
    h = sum(jnp.einsum('hc,bct->bht', w1[:, :, k],
                       xp[:, :, k * dilation:k * dilation + T], precision=hp)
            for k in range(K)) + b1[None, :, None]
    m = jnp.mean(h, axis=(1, 2), keepdims=True)
    v = jnp.mean(jnp.square(h - m), axis=(1, 2), keepdims=True)
    h = (h - m) * jax.lax.rsqrt(v + eps) * g1[None, :, None] + be1[None, :, None]
    h = _gelu_tanh(h)
    z = jnp.einsum('oh,bht->bot', w2[:, :, 0], h, precision=hp) + b2[None, :, None]
    m2 = jnp.mean(z, axis=(1, 2), keepdims=True)
    v2 = jnp.mean(jnp.square(z - m2), axis=(1, 2), keepdims=True)
    z = (z - m2) * jax.lax.rsqrt(v2 + eps) * g2[None, :, None] + be2[None, :, None]
    glu = z[:, :C] * jax.nn.sigmoid(z[:, C:])
    return x + ls[None, :, None] * glu


def ref_dconv_forward(x, layer_params):
    for d, p in enumerate(layer_params):
        x = _ref_dconv_layer(x, p, dilation=2 ** d)
    return x


if __name__ == "__main__":
    key = jax.random.PRNGKey(0)
    k_p, k_x = jax.random.split(key)

    B, C, T = 2, 32, 128          # channels=32, compress=4 -> hidden=8
    depth = 2                     # dilations 1, 2
    params = make_dconv_params(k_p, C, compress=4, depth=depth, kernel_size=3)
    x = jax.random.normal(k_x, (B, C, T), dtype=jnp.float32)

    out = jax.block_until_ready(dconv_forward(x, params))
    ref = ref_dconv_forward(x, params)

    assert out.shape == (B, C, T)
    assert out.dtype == jnp.float32
    # Tolerance leaves headroom for the MXU's f32 matmul pass decomposition.
    assert jnp.allclose(out, ref, atol=1e-3, rtol=1e-3), (
        "mismatch vs reference: max abs err "
        f"{float(jnp.max(jnp.abs(out - ref)))}")

    print("KERNEL_OK")
</pallas_src>

<mosaic_0001>
module attributes {stable_mosaic.version = 11 : i64} {
  func.func @_dconv_kernel(%arg0: i32, %arg1: memref<1x32x128xf32, #tpu.memory_space<vmem>>, %arg2: memref<2x24x32xf32, #tpu.memory_space<vmem>>, %arg3: memref<2x64x8xf32, #tpu.memory_space<vmem>>, %arg4: memref<2x64x8xf32, #tpu.memory_space<vmem>>, %arg5: memref<1x32x128xf32, #tpu.memory_space<vmem>>) attributes {dimension_semantics = [#tpu.dimension_semantics<parallel>], iteration_bounds = array<i64: 2>, scalar_prefetch = 0 : i64, scratch_operands = 0 : i64, tpu.core_type = #tpu.core_type<tc>, window_params = [{transform_indices = @transform_0, window_bounds = array<i64: 1, 32, 128>}, {pipeline_mode = #tpu.pipeline_mode<synchronous>, transform_indices = @transform_1, window_bounds = array<i64: 2, 24, 32>}, {pipeline_mode = #tpu.pipeline_mode<synchronous>, transform_indices = @transform_2, window_bounds = array<i64: 2, 64, 8>}, {pipeline_mode = #tpu.pipeline_mode<synchronous>, transform_indices = @transform_3, window_bounds = array<i64: 2, 64, 8>}, {transform_indices = @transform_4, window_bounds = array<i64: 1, 32, 128>}]} {
    %c0 = arith.constant 0 : index
    %c0_0 = arith.constant 0 : index
    %c0_1 = arith.constant 0 : index
    %0 = vector.load %arg1[%c0, %c0_0, %c0_1] : memref<1x32x128xf32, #tpu.memory_space<vmem>>, vector<1x32x128xf32>
    %1 = vector.shape_cast %0 : vector<1x32x128xf32> to vector<32x128xf32>
    %2 = tpu.iota {dimensions = array<i32: 1>} : vector<1x128xi32>
    %c0_2 = arith.constant 0 : index
    %c0_3 = arith.constant 0 : index
    %c0_4 = arith.constant 0 : index
    %3 = vector.load %arg2[%c0_2, %c0_3, %c0_4] : memref<2x24x32xf32, #tpu.memory_space<vmem>>, vector<1x24x32xf32>
    %4 = vector.shape_cast %3 : vector<1x24x32xf32> to vector<24x32xf32>
    %cst = arith.constant dense<0.000000e+00> : vector<24x128xf32>
    %5 = tpu.matmul %4, %1, %cst {dimension_numbers = #tpu.dot_dimension_numbers<[1], [0], [0], [1], [0, 0, 1, 1], [], []>} : vector<24x32xf32>, vector<32x128xf32>, vector<24x128xf32> -> vector<24x128xf32>
    %6 = vector.extract_strided_slice %5 {offsets = [8, 0], sizes = [8, 128], strides = [1, 1]} : vector<24x128xf32> to vector<8x128xf32>
    %7 = vector.extract_strided_slice %5 {offsets = [0, 0], sizes = [8, 128], strides = [1, 1]} : vector<24x128xf32> to vector<8x128xf32>
    %c1_i32 = arith.constant 1 : i32
    %8 = tpu.dynamic_rotate %7 by %c1_i32 dim 1 : vector<8x128xf32>, i32 -> vector<8x128xf32>
    %c-1_i32 = arith.constant -1 : i32
    %9 = vector.broadcast %c-1_i32 : i32 to vector<1x128xi32>
    %10 = arith.addi %2, %9 : vector<1x128xi32>
    %c0_i32 = arith.constant 0 : i32
    %11 = vector.broadcast %c0_i32 : i32 to vector<1x128xi32>
    %12 = arith.cmpi sge, %10, %11 : vector<1x128xi32>
    %c-1_i32_5 = arith.constant -1 : i32
    %13 = vector.broadcast %c-1_i32_5 : i32 to vector<1x128xi32>
    %14 = arith.addi %2, %13 : vector<1x128xi32>
    %c128_i32 = arith.constant 128 : i32
    %15 = vector.broadcast %c128_i32 : i32 to vector<1x128xi32>
    %16 = arith.cmpi slt, %14, %15 : vector<1x128xi32>
    %17 = arith.andi %12, %16 : vector<1x128xi1>
    %18 = arith.extui %17 : vector<1x128xi1> to vector<1x128xi32>
    %19 = arith.sitofp %18 : vector<1x128xi32> to vector<1x128xf32>
    %20 = vector.broadcast %19 : vector<1x128xf32> to vector<8x128xf32>
    %21 = arith.mulf %8, %20 : vector<8x128xf32>
    %22 = arith.addf %6, %21 : vector<8x128xf32>
    %23 = vector.extract_strided_slice %5 {offsets = [16, 0], sizes = [8, 128], strides = [1, 1]} : vector<24x128xf32> to vector<8x128xf32>
    %c127_i32 = arith.constant 127 : i32
    %24 = tpu.dynamic_rotate %23 by %c127_i32 dim 1 : vector<8x128xf32>, i32 -> vector<8x128xf32>
    %c1_i32_6 = arith.constant 1 : i32
    %25 = vector.broadcast %c1_i32_6 : i32 to vector<1x128xi32>
    %26 = arith.addi %2, %25 : vector<1x128xi32>
    %c0_i32_7 = arith.constant 0 : i32
    %27 = vector.broadcast %c0_i32_7 : i32 to vector<1x128xi32>
    %28 = arith.cmpi sge, %26, %27 : vector<1x128xi32>
    %c1_i32_8 = arith.constant 1 : i32
    %29 = vector.broadcast %c1_i32_8 : i32 to vector<1x128xi32>
    %30 = arith.addi %2, %29 : vector<1x128xi32>
    %c128_i32_9 = arith.constant 128 : i32
    %31 = vector.broadcast %c128_i32_9 : i32 to vector<1x128xi32>
    %32 = arith.cmpi slt, %30, %31 : vector<1x128xi32>
    %33 = arith.andi %28, %32 : vector<1x128xi1>
    %34 = arith.extui %33 : vector<1x128xi1> to vector<1x128xi32>
    %35 = arith.sitofp %34 : vector<1x128xi32> to vector<1x128xf32>
    %36 = vector.broadcast %35 : vector<1x128xf32> to vector<8x128xf32>
    %37 = arith.mulf %24, %36 : vector<8x128xf32>
    %38 = arith.addf %22, %37 : vector<8x128xf32>
    %c0_10 = arith.constant 0 : index
    %c0_11 = arith.constant 0 : index
    %c0_12 = arith.constant 0 : index
    %39 = vector.load %arg4[%c0_10, %c0_11, %c0_12] : memref<2x64x8xf32, #tpu.memory_space<vmem>>, vector<1x8x1xf32>
    %40 = vector.shape_cast %39 : vector<1x8x1xf32> to vector<8x1xf32>
    %c0_13 = arith.constant 0 : index
    %c0_14 = arith.constant 0 : index
    %c1 = arith.constant 1 : index
    %41 = vector.load %arg4[%c0_13, %c0_14, %c1] : memref<2x64x8xf32, #tpu.memory_space<vmem>>, vector<1x8x1xf32>
    %42 = vector.shape_cast %41 : vector<1x8x1xf32> to vector<8x1xf32>
    %c0_15 = arith.constant 0 : index
    %c0_16 = arith.constant 0 : index
    %c2 = arith.constant 2 : index
    %43 = vector.load %arg4[%c0_15, %c0_16, %c2] : memref<2x64x8xf32, #tpu.memory_space<vmem>>, vector<1x8x1xf32>
    %44 = vector.shape_cast %43 : vector<1x8x1xf32> to vector<8x1xf32>
    %45 = vector.broadcast %40 : vector<8x1xf32> to vector<8x128xf32>
    %46 = arith.addf %38, %45 : vector<8x128xf32>
    %cst_17 = arith.constant dense<0.000000e+00> : vector<8xf32>
    %47 = vector.multi_reduction <add>, %46, %cst_17 [1] : vector<8x128xf32> to vector<8xf32>
    %48 = vector.shape_cast %47 : vector<8xf32> to vector<8x1xf32>
    %cst_18 = arith.constant 1.280000e+02 : f32
    %49 = vector.broadcast %cst_18 : f32 to vector<8x1xf32>
    %50 = arith.divf %48, %49 : vector<8x1xf32>
    %cst_19 = arith.constant dense<0.000000e+00> : vector<1xf32>
    %51 = vector.multi_reduction <add>, %50, %cst_19 [0] : vector<8x1xf32> to vector<1xf32>
    %52 = vector.shape_cast %51 : vector<1xf32> to vector<1x1xf32>
    %cst_20 = arith.constant 8.000000e+00 : f32
    %53 = vector.broadcast %cst_20 : f32 to vector<1x1xf32>
    %54 = arith.divf %52, %53 : vector<1x1xf32>
    %55 = vector.broadcast %54 : vector<1x1xf32> to vector<8x128xf32>
    %56 = arith.subf %46, %55 : vector<8x128xf32>
    %57 = arith.mulf %56, %56 : vector<8x128xf32>
    %cst_21 = arith.constant dense<0.000000e+00> : vector<8xf32>
    %58 = vector.multi_reduction <add>, %57, %cst_21 [1] : vector<8x128xf32> to vector<8xf32>
    %59 = vector.shape_cast %58 : vector<8xf32> to vector<8x1xf32>
    %cst_22 = arith.constant 1.280000e+02 : f32
    %60 = vector.broadcast %cst_22 : f32 to vector<8x1xf32>
    %61 = arith.divf %59, %60 : vector<8x1xf32>
    %cst_23 = arith.constant dense<0.000000e+00> : vector<1xf32>
    %62 = vector.multi_reduction <add>, %61, %cst_23 [0] : vector<8x1xf32> to vector<1xf32>
    %63 = vector.shape_cast %62 : vector<1xf32> to vector<1x1xf32>
    %cst_24 = arith.constant 8.000000e+00 : f32
    %64 = vector.broadcast %cst_24 : f32 to vector<1x1xf32>
    %65 = arith.divf %63, %64 : vector<1x1xf32>
    %66 = vector.broadcast %54 : vector<1x1xf32> to vector<8x128xf32>
    %67 = arith.subf %46, %66 : vector<8x128xf32>
    %cst_25 = arith.constant 9.99999974E-6 : f32
    %68 = vector.broadcast %cst_25 : f32 to vector<1x1xf32>
    %69 = arith.addf %65, %68 : vector<1x1xf32>
    %70 = math.rsqrt %69 : vector<1x1xf32>
    %71 = vector.broadcast %70 : vector<1x1xf32> to vector<8x128xf32>
    %72 = arith.mulf %67, %71 : vector<8x128xf32>
    %73 = vector.broadcast %42 : vector<8x1xf32> to vector<8x128xf32>
    %74 = arith.mulf %72, %73 : vector<8x128xf32>
    %75 = vector.broadcast %44 : vector<8x1xf32> to vector<8x128xf32>
    %76 = arith.addf %74, %75 : vector<8x128xf32>
    %cst_26 = arith.constant 5.000000e-01 : f32
    %77 = vector.broadcast %cst_26 : f32 to vector<8x128xf32>
    %78 = arith.mulf %77, %76 : vector<8x128xf32>
    %cst_27 = arith.constant 4.471500e-02 : f32
    %79 = vector.broadcast %cst_27 : f32 to vector<8x128xf32>
    %80 = arith.mulf %79, %76 : vector<8x128xf32>
    %81 = arith.mulf %80, %76 : vector<8x128xf32>
    %82 = arith.mulf %81, %76 : vector<8x128xf32>
    %83 = arith.addf %76, %82 : vector<8x128xf32>
    %cst_28 = arith.constant 0.797884583 : f32
    %84 = vector.broadcast %cst_28 : f32 to vector<8x128xf32>
    %85 = arith.mulf %84, %83 : vector<8x128xf32>
    %86 = math.tanh %85 : vector<8x128xf32>
    %cst_29 = arith.constant 1.000000e+00 : f32
    %87 = vector.broadcast %cst_29 : f32 to vector<8x128xf32>
    %88 = arith.addf %87, %86 : vector<8x128xf32>
    %89 = arith.mulf %78, %88 : vector<8x128xf32>
    %c0_30 = arith.constant 0 : index
    %c0_31 = arith.constant 0 : index
    %c3 = arith.constant 3 : index
    %90 = vector.load %arg4[%c0_30, %c0_31, %c3] : memref<2x64x8xf32, #tpu.memory_space<vmem>>, vector<1x64x1xf32>
    %91 = vector.shape_cast %90 : vector<1x64x1xf32> to vector<64x1xf32>
    %c0_32 = arith.constant 0 : index
    %c0_33 = arith.constant 0 : index
    %c4 = arith.constant 4 : index
    %92 = vector.load %arg4[%c0_32, %c0_33, %c4] : memref<2x64x8xf32, #tpu.memory_space<vmem>>, vector<1x64x1xf32>
    %93 = vector.shape_cast %92 : vector<1x64x1xf32> to vector<64x1xf32>
    %c0_34 = arith.constant 0 : index
    %c0_35 = arith.constant 0 : index
    %c5 = arith.constant 5 : index
    %94 = vector.load %arg4[%c0_34, %c0_35, %c5] : memref<2x64x8xf32, #tpu.memory_space<vmem>>, vector<1x64x1xf32>
    %95 = vector.shape_cast %94 : vector<1x64x1xf32> to vector<64x1xf32>
    %c0_36 = arith.constant 0 : index
    %c0_37 = arith.constant 0 : index
    %c0_38 = arith.constant 0 : index
    %96 = vector.load %arg3[%c0_36, %c0_37, %c0_38] : memref<2x64x8xf32, #tpu.memory_space<vmem>>, vector<1x64x8xf32>
    %97 = vector.shape_cast %96 : vector<1x64x8xf32> to vector<64x8xf32>
    %cst_39 = arith.constant dense<0.000000e+00> : vector<64x128xf32>
    %98 = tpu.matmul %97, %89, %cst_39 {dimension_numbers = #tpu.dot_dimension_numbers<[1], [0], [0], [1], [0, 0, 1, 1], [], []>} : vector<64x8xf32>, vector<8x128xf32>, vector<64x128xf32> -> vector<64x128xf32>
    %99 = vector.broadcast %91 : vector<64x1xf32> to vector<64x128xf32>
    %100 = arith.addf %98, %99 : vector<64x128xf32>
    %cst_40 = arith.constant dense<0.000000e+00> : vector<64xf32>
    %101 = vector.multi_reduction <add>, %100, %cst_40 [1] : vector<64x128xf32> to vector<64xf32>
    %102 = vector.shape_cast %101 : vector<64xf32> to vector<64x1xf32>
    %cst_41 = arith.constant 1.280000e+02 : f32
    %103 = vector.broadcast %cst_41 : f32 to vector<64x1xf32>
    %104 = arith.divf %102, %103 : vector<64x1xf32>
    %cst_42 = arith.constant dense<0.000000e+00> : vector<1xf32>
    %105 = vector.multi_reduction <add>, %104, %cst_42 [0] : vector<64x1xf32> to vector<1xf32>
    %106 = vector.shape_cast %105 : vector<1xf32> to vector<1x1xf32>
    %cst_43 = arith.constant 6.400000e+01 : f32
    %107 = vector.broadcast %cst_43 : f32 to vector<1x1xf32>
    %108 = arith.divf %106, %107 : vector<1x1xf32>
    %109 = vector.broadcast %108 : vector<1x1xf32> to vector<64x128xf32>
    %110 = arith.subf %100, %109 : vector<64x128xf32>
    %111 = arith.mulf %110, %110 : vector<64x128xf32>
    %cst_44 = arith.constant dense<0.000000e+00> : vector<64xf32>
    %112 = vector.multi_reduction <add>, %111, %cst_44 [1] : vector<64x128xf32> to vector<64xf32>
    %113 = vector.shape_cast %112 : vector<64xf32> to vector<64x1xf32>
    %cst_45 = arith.constant 1.280000e+02 : f32
    %114 = vector.broadcast %cst_45 : f32 to vector<64x1xf32>
    %115 = arith.divf %113, %114 : vector<64x1xf32>
    %cst_46 = arith.constant dense<0.000000e+00> : vector<1xf32>
    %116 = vector.multi_reduction <add>, %115, %cst_46 [0] : vector<64x1xf32> to vector<1xf32>
    %117 = vector.shape_cast %116 : vector<1xf32> to vector<1x1xf32>
    %cst_47 = arith.constant 6.400000e+01 : f32
    %118 = vector.broadcast %cst_47 : f32 to vector<1x1xf32>
    %119 = arith.divf %117, %118 : vector<1x1xf32>
    %120 = vector.broadcast %108 : vector<1x1xf32> to vector<64x128xf32>
    %121 = arith.subf %100, %120 : vector<64x128xf32>
    %cst_48 = arith.constant 9.99999974E-6 : f32
    %122 = vector.broadcast %cst_48 : f32 to vector<1x1xf32>
    %123 = arith.addf %119, %122 : vector<1x1xf32>
    %124 = math.rsqrt %123 : vector<1x1xf32>
    %125 = vector.broadcast %124 : vector<1x1xf32> to vector<64x128xf32>
    %126 = arith.mulf %121, %125 : vector<64x128xf32>
    %127 = vector.broadcast %93 : vector<64x1xf32> to vector<64x128xf32>
    %128 = arith.mulf %126, %127 : vector<64x128xf32>
    %129 = vector.broadcast %95 : vector<64x1xf32> to vector<64x128xf32>
    %130 = arith.addf %128, %129 : vector<64x128xf32>
    %c0_49 = arith.constant 0 : index
    %c0_50 = arith.constant 0 : index
    %c6 = arith.constant 6 : index
    %131 = vector.load %arg4[%c0_49, %c0_50, %c6] : memref<2x64x8xf32, #tpu.memory_space<vmem>>, vector<1x32x1xf32>
    %132 = vector.shape_cast %131 : vector<1x32x1xf32> to vector<32x1xf32>
    %133 = vector.extract_strided_slice %130 {offsets = [0, 0], sizes = [32, 128], strides = [1, 1]} : vector<64x128xf32> to vector<32x128xf32>
    %134 = vector.extract_strided_slice %130 {offsets = [32, 0], sizes = [32, 128], strides = [1, 1]} : vector<64x128xf32> to vector<32x128xf32>
    %135 = arith.negf %134 : vector<32x128xf32>
    %136 = math.exp %135 : vector<32x128xf32>
    %cst_51 = arith.constant 1.000000e+00 : f32
    %137 = vector.broadcast %cst_51 : f32 to vector<32x128xf32>
    %138 = arith.addf %137, %136 : vector<32x128xf32>
    %139 = arith.divf %137, %138 : vector<32x128xf32>
    %140 = arith.mulf %133, %139 : vector<32x128xf32>
    %141 = vector.broadcast %132 : vector<32x1xf32> to vector<32x128xf32>
    %142 = arith.mulf %141, %140 : vector<32x128xf32>
    %143 = arith.addf %1, %142 : vector<32x128xf32>
    %c1_52 = arith.constant 1 : index
    %c0_53 = arith.constant 0 : index
    %c0_54 = arith.constant 0 : index
    %144 = vector.load %arg2[%c1_52, %c0_53, %c0_54] : memref<2x24x32xf32, #tpu.memory_space<vmem>>, vector<1x24x32xf32>
    %145 = vector.shape_cast %144 : vector<1x24x32xf32> to vector<24x32xf32>
    %cst_55 = arith.constant dense<0.000000e+00> : vector<24x128xf32>
    %146 = tpu.matmul %145, %143, %cst_55 {dimension_numbers = #tpu.dot_dimension_numbers<[1], [0], [0], [1], [0, 0, 1, 1], [], []>} : vector<24x32xf32>, vector<32x128xf32>, vector<24x128xf32> -> vector<24x128xf32>
    %147 = vector.extract_strided_slice %146 {offsets = [8, 0], sizes = [8, 128], strides = [1, 1]} : vector<24x128xf32> to vector<8x128xf32>
    %148 = vector.extract_strided_slice %146 {offsets = [0, 0], sizes = [8, 128], strides = [1, 1]} : vector<24x128xf32> to vector<8x128xf32>
    %c2_i32 = arith.constant 2 : i32
    %149 = tpu.dynamic_rotate %148 by %c2_i32 dim 1 : vector<8x128xf32>, i32 -> vector<8x128xf32>
    %c-2_i32 = arith.constant -2 : i32
    %150 = vector.broadcast %c-2_i32 : i32 to vector<1x128xi32>
    %151 = arith.addi %2, %150 : vector<1x128xi32>
    %c0_i32_56 = arith.constant 0 : i32
    %152 = vector.broadcast %c0_i32_56 : i32 to vector<1x128xi32>
    %153 = arith.cmpi sge, %151, %152 : vector<1x128xi32>
    %c-2_i32_57 = arith.constant -2 : i32
    %154 = vector.broadcast %c-2_i32_57 : i32 to vector<1x128xi32>
    %155 = arith.addi %2, %154 : vector<1x128xi32>
    %c128_i32_58 = arith.constant 128 : i32
    %156 = vector.broadcast %c128_i32_58 : i32 to vector<1x128xi32>
    %157 = arith.cmpi slt, %155, %156 : vector<1x128xi32>
    %158 = arith.andi %153, %157 : vector<1x128xi1>
    %159 = arith.extui %158 : vector<1x128xi1> to vector<1x128xi32>
    %160 = arith.sitofp %159 : vector<1x128xi32> to vector<1x128xf32>
    %161 = vector.broadcast %160 : vector<1x128xf32> to vector<8x128xf32>
    %162 = arith.mulf %149, %161 : vector<8x128xf32>
    %163 = arith.addf %147, %162 : vector<8x128xf32>
    %164 = vector.extract_strided_slice %146 {offsets = [16, 0], sizes = [8, 128], strides = [1, 1]} : vector<24x128xf32> to vector<8x128xf32>
    %c126_i32 = arith.constant 126 : i32
    %165 = tpu.dynamic_rotate %164 by %c126_i32 dim 1 : vector<8x128xf32>, i32 -> vector<8x128xf32>
    %c2_i32_59 = arith.constant 2 : i32
    %166 = vector.broadcast %c2_i32_59 : i32 to vector<1x128xi32>
    %167 = arith.addi %2, %166 : vector<1x128xi32>
    %c0_i32_60 = arith.constant 0 : i32
    %168 = vector.broadcast %c0_i32_60 : i32 to vector<1x128xi32>
    %169 = arith.cmpi sge, %167, %168 : vector<1x128xi32>
    %c2_i32_61 = arith.constant 2 : i32
    %170 = vector.broadcast %c2_i32_61 : i32 to vector<1x128xi32>
    %171 = arith.addi %2, %170 : vector<1x128xi32>
    %c128_i32_62 = arith.constant 128 : i32
    %172 = vector.broadcast %c128_i32_62 : i32 to vector<1x128xi32>
    %173 = arith.cmpi slt, %171, %172 : vector<1x128xi32>
    %174 = arith.andi %169, %173 : vector<1x128xi1>
    %175 = arith.extui %174 : vector<1x128xi1> to vector<1x128xi32>
    %176 = arith.sitofp %175 : vector<1x128xi32> to vector<1x128xf32>
    %177 = vector.broadcast %176 : vector<1x128xf32> to vector<8x128xf32>
    %178 = arith.mulf %165, %177 : vector<8x128xf32>
    %179 = arith.addf %163, %178 : vector<8x128xf32>
    %c1_63 = arith.constant 1 : index
    %c0_64 = arith.constant 0 : index
    %c0_65 = arith.constant 0 : index
    %180 = vector.load %arg4[%c1_63, %c0_64, %c0_65] : memref<2x64x8xf32, #tpu.memory_space<vmem>>, vector<1x8x1xf32>
    %181 = vector.shape_cast %180 : vector<1x8x1xf32> to vector<8x1xf32>
    %c1_66 = arith.constant 1 : index
    %c0_67 = arith.constant 0 : index
    %c1_68 = arith.constant 1 : index
    %182 = vector.load %arg4[%c1_66, %c0_67, %c1_68] : memref<2x64x8xf32, #tpu.memory_space<vmem>>, vector<1x8x1xf32>
    %183 = vector.shape_cast %182 : vector<1x8x1xf32> to vector<8x1xf32>
    %c1_69 = arith.constant 1 : index
    %c0_70 = arith.constant 0 : index
    %c2_71 = arith.constant 2 : index
    %184 = vector.load %arg4[%c1_69, %c0_70, %c2_71] : memref<2x64x8xf32, #tpu.memory_space<vmem>>, vector<1x8x1xf32>
    %185 = vector.shape_cast %184 : vector<1x8x1xf32> to vector<8x1xf32>
    %186 = vector.broadcast %181 : vector<8x1xf32> to vector<8x128xf32>
    %187 = arith.addf %179, %186 : vector<8x128xf32>
    %cst_72 = arith.constant dense<0.000000e+00> : vector<8xf32>
    %188 = vector.multi_reduction <add>, %187, %cst_72 [1] : vector<8x128xf32> to vector<8xf32>
    %189 = vector.shape_cast %188 : vector<8xf32> to vector<8x1xf32>
    %cst_73 = arith.constant 1.280000e+02 : f32
    %190 = vector.broadcast %cst_73 : f32 to vector<8x1xf32>
    %191 = arith.divf %189, %190 : vector<8x1xf32>
    %cst_74 = arith.constant dense<0.000000e+00> : vector<1xf32>
    %192 = vector.multi_reduction <add>, %191, %cst_74 [0] : vector<8x1xf32> to vector<1xf32>
    %193 = vector.shape_cast %192 : vector<1xf32> to vector<1x1xf32>
    %cst_75 = arith.constant 8.000000e+00 : f32
    %194 = vector.broadcast %cst_75 : f32 to vector<1x1xf32>
    %195 = arith.divf %193, %194 : vector<1x1xf32>
    %196 = vector.broadcast %195 : vector<1x1xf32> to vector<8x128xf32>
    %197 = arith.subf %187, %196 : vector<8x128xf32>
    %198 = arith.mulf %197, %197 : vector<8x128xf32>
    %cst_76 = arith.constant dense<0.000000e+00> : vector<8xf32>
    %199 = vector.multi_reduction <add>, %198, %cst_76 [1] : vector<8x128xf32> to vector<8xf32>
    %200 = vector.shape_cast %199 : vector<8xf32> to vector<8x1xf32>
    %cst_77 = arith.constant 1.280000e+02 : f32
    %201 = vector.broadcast %cst_77 : f32 to vector<8x1xf32>
    %202 = arith.divf %200, %201 : vector<8x1xf32>
    %cst_78 = arith.constant dense<0.000000e+00> : vector<1xf32>
    %203 = vector.multi_reduction <add>, %202, %cst_78 [0] : vector<8x1xf32> to vector<1xf32>
    %204 = vector.shape_cast %203 : vector<1xf32> to vector<1x1xf32>
    %cst_79 = arith.constant 8.000000e+00 : f32
    %205 = vector.broadcast %cst_79 : f32 to vector<1x1xf32>
    %206 = arith.divf %204, %205 : vector<1x1xf32>
    %207 = vector.broadcast %195 : vector<1x1xf32> to vector<8x128xf32>
    %208 = arith.subf %187, %207 : vector<8x128xf32>
    %cst_80 = arith.constant 9.99999974E-6 : f32
    %209 = vector.broadcast %cst_80 : f32 to vector<1x1xf32>
    %210 = arith.addf %206, %209 : vector<1x1xf32>
    %211 = math.rsqrt %210 : vector<1x1xf32>
    %212 = vector.broadcast %211 : vector<1x1xf32> to vector<8x128xf32>
    %213 = arith.mulf %208, %212 : vector<8x128xf32>
    %214 = vector.broadcast %183 : vector<8x1xf32> to vector<8x128xf32>
    %215 = arith.mulf %213, %214 : vector<8x128xf32>
    %216 = vector.broadcast %185 : vector<8x1xf32> to vector<8x128xf32>
    %217 = arith.addf %215, %216 : vector<8x128xf32>
    %cst_81 = arith.constant 5.000000e-01 : f32
    %218 = vector.broadcast %cst_81 : f32 to vector<8x128xf32>
    %219 = arith.mulf %218, %217 : vector<8x128xf32>
    %cst_82 = arith.constant 4.471500e-02 : f32
    %220 = vector.broadcast %cst_82 : f32 to vector<8x128xf32>
    %221 = arith.mulf %220, %217 : vector<8x128xf32>
    %222 = arith.mulf %221, %217 : vector<8x128xf32>
    %223 = arith.mulf %222, %217 : vector<8x128xf32>
    %224 = arith.addf %217, %223 : vector<8x128xf32>
    %cst_83 = arith.constant 0.797884583 : f32
    %225 = vector.broadcast %cst_83 : f32 to vector<8x128xf32>
    %226 = arith.mulf %225, %224 : vector<8x128xf32>
    %227 = math.tanh %226 : vector<8x128xf32>
    %cst_84 = arith.constant 1.000000e+00 : f32
    %228 = vector.broadcast %cst_84 : f32 to vector<8x128xf32>
    %229 = arith.addf %228, %227 : vector<8x128xf32>
    %230 = arith.mulf %219, %229 : vector<8x128xf32>
    %c1_85 = arith.constant 1 : index
    %c0_86 = arith.constant 0 : index
    %c3_87 = arith.constant 3 : index
    %231 = vector.load %arg4[%c1_85, %c0_86, %c3_87] : memref<2x64x8xf32, #tpu.memory_space<vmem>>, vector<1x64x1xf32>
    %232 = vector.shape_cast %231 : vector<1x64x1xf32> to vector<64x1xf32>
    %c1_88 = arith.constant 1 : index
    %c0_89 = arith.constant 0 : index
    %c4_90 = arith.constant 4 : index
    %233 = vector.load %arg4[%c1_88, %c0_89, %c4_90] : memref<2x64x8xf32, #tpu.memory_space<vmem>>, vector<1x64x1xf32>
    %234 = vector.shape_cast %233 : vector<1x64x1xf32> to vector<64x1xf32>
    %c1_91 = arith.constant 1 : index
    %c0_92 = arith.constant 0 : index
    %c5_93 = arith.constant 5 : index
    %235 = vector.load %arg4[%c1_91, %c0_92, %c5_93] : memref<2x64x8xf32, #tpu.memory_space<vmem>>, vector<1x64x1xf32>
    %236 = vector.shape_cast %235 : vector<1x64x1xf32> to vector<64x1xf32>
    %c1_94 = arith.constant 1 : index
    %c0_95 = arith.constant 0 : index
    %c0_96 = arith.constant 0 : index
    %237 = vector.load %arg3[%c1_94, %c0_95, %c0_96] : memref<2x64x8xf32, #tpu.memory_space<vmem>>, vector<1x64x8xf32>
    %238 = vector.shape_cast %237 : vector<1x64x8xf32> to vector<64x8xf32>
    %cst_97 = arith.constant dense<0.000000e+00> : vector<64x128xf32>
    %239 = tpu.matmul %238, %230, %cst_97 {dimension_numbers = #tpu.dot_dimension_numbers<[1], [0], [0], [1], [0, 0, 1, 1], [], []>} : vector<64x8xf32>, vector<8x128xf32>, vector<64x128xf32> -> vector<64x128xf32>
    %240 = vector.broadcast %232 : vector<64x1xf32> to vector<64x128xf32>
    %241 = arith.addf %239, %240 : vector<64x128xf32>
    %cst_98 = arith.constant dense<0.000000e+00> : vector<64xf32>
    %242 = vector.multi_reduction <add>, %241, %cst_98 [1] : vector<64x128xf32> to vector<64xf32>
    %243 = vector.shape_cast %242 : vector<64xf32> to vector<64x1xf32>
    %cst_99 = arith.constant 1.280000e+02 : f32
    %244 = vector.broadcast %cst_99 : f32 to vector<64x1xf32>
    %245 = arith.divf %243, %244 : vector<64x1xf32>
    %cst_100 = arith.constant dense<0.000000e+00> : vector<1xf32>
    %246 = vector.multi_reduction <add>, %245, %cst_100 [0] : vector<64x1xf32> to vector<1xf32>
    %247 = vector.shape_cast %246 : vector<1xf32> to vector<1x1xf32>
    %cst_101 = arith.constant 6.400000e+01 : f32
    %248 = vector.broadcast %cst_101 : f32 to vector<1x1xf32>
    %249 = arith.divf %247, %248 : vector<1x1xf32>
    %250 = vector.broadcast %249 : vector<1x1xf32> to vector<64x128xf32>
    %251 = arith.subf %241, %250 : vector<64x128xf32>
    %252 = arith.mulf %251, %251 : vector<64x128xf32>
    %cst_102 = arith.constant dense<0.000000e+00> : vector<64xf32>
    %253 = vector.multi_reduction <add>, %252, %cst_102 [1] : vector<64x128xf32> to vector<64xf32>
    %254 = vector.shape_cast %253 : vector<64xf32> to vector<64x1xf32>
    %cst_103 = arith.constant 1.280000e+02 : f32
    %255 = vector.broadcast %cst_103 : f32 to vector<64x1xf32>
    %256 = arith.divf %254, %255 : vector<64x1xf32>
    %cst_104 = arith.constant dense<0.000000e+00> : vector<1xf32>
    %257 = vector.multi_reduction <add>, %256, %cst_104 [0] : vector<64x1xf32> to vector<1xf32>
    %258 = vector.shape_cast %257 : vector<1xf32> to vector<1x1xf32>
    %cst_105 = arith.constant 6.400000e+01 : f32
    %259 = vector.broadcast %cst_105 : f32 to vector<1x1xf32>
    %260 = arith.divf %258, %259 : vector<1x1xf32>
    %261 = vector.broadcast %249 : vector<1x1xf32> to vector<64x128xf32>
    %262 = arith.subf %241, %261 : vector<64x128xf32>
    %cst_106 = arith.constant 9.99999974E-6 : f32
    %263 = vector.broadcast %cst_106 : f32 to vector<1x1xf32>
    %264 = arith.addf %260, %263 : vector<1x1xf32>
    %265 = math.rsqrt %264 : vector<1x1xf32>
    %266 = vector.broadcast %265 : vector<1x1xf32> to vector<64x128xf32>
    %267 = arith.mulf %262, %266 : vector<64x128xf32>
    %268 = vector.broadcast %234 : vector<64x1xf32> to vector<64x128xf32>
    %269 = arith.mulf %267, %268 : vector<64x128xf32>
    %270 = vector.broadcast %236 : vector<64x1xf32> to vector<64x128xf32>
    %271 = arith.addf %269, %270 : vector<64x128xf32>
    %c1_107 = arith.constant 1 : index
    %c0_108 = arith.constant 0 : index
    %c6_109 = arith.constant 6 : index
    %272 = vector.load %arg4[%c1_107, %c0_108, %c6_109] : memref<2x64x8xf32, #tpu.memory_space<vmem>>, vector<1x32x1xf32>
    %273 = vector.shape_cast %272 : vector<1x32x1xf32> to vector<32x1xf32>
    %274 = vector.extract_strided_slice %271 {offsets = [0, 0], sizes = [32, 128], strides = [1, 1]} : vector<64x128xf32> to vector<32x128xf32>
    %275 = vector.extract_strided_slice %271 {offsets = [32, 0], sizes = [32, 128], strides = [1, 1]} : vector<64x128xf32> to vector<32x128xf32>
    %276 = arith.negf %275 : vector<32x128xf32>
    %277 = math.exp %276 : vector<32x128xf32>
    %cst_110 = arith.constant 1.000000e+00 : f32
    %278 = vector.broadcast %cst_110 : f32 to vector<32x128xf32>
    %279 = arith.addf %278, %277 : vector<32x128xf32>
    %280 = arith.divf %278, %279 : vector<32x128xf32>
    %281 = arith.mulf %274, %280 : vector<32x128xf32>
    %282 = vector.broadcast %273 : vector<32x1xf32> to vector<32x128xf32>
    %283 = arith.mulf %282, %281 : vector<32x128xf32>
    %284 = arith.addf %143, %283 : vector<32x128xf32>
    %c0_111 = arith.constant 0 : index
    %c0_112 = arith.constant 0 : index
    %c0_113 = arith.constant 0 : index
    %285 = vector.load %arg5[%c0_111, %c0_112, %c0_113] : memref<1x32x128xf32, #tpu.memory_space<vmem>>, vector<1x32x128xf32>
    %286 = vector.shape_cast %285 : vector<1x32x128xf32> to vector<32x128xf32>
    %287 = vector.shape_cast %284 : vector<32x128xf32> to vector<1x32x128xf32>
    tpu.vector_store %arg5[%c0_111, %c0_112, %c0_113], %287 {strides = array<i32>} : memref<1x32x128xf32, #tpu.memory_space<vmem>>, vector<1x32x128xf32>,
    return
  }
  func.func @transform_0(%arg0: i32) -> (i32, i32, i32) {
    %c0_i32 = arith.constant 0 : i32
    %c0_i32_0 = arith.constant 0 : i32
    %c0_i32_1 = arith.constant 0 : i32
    return %arg0, %c0_i32, %c0_i32_0 : i32, i32, i32
  }
  func.func @transform_1(%arg0: i32) -> (i32, i32, i32) {
    %c0_i32 = arith.constant 0 : i32
    %c0_i32_0 = arith.constant 0 : i32
    %c0_i32_1 = arith.constant 0 : i32
    %c0_i32_2 = arith.constant 0 : i32
    return %c0_i32, %c0_i32_0, %c0_i32_1 : i32, i32, i32
  }
  func.func @transform_2(%arg0: i32) -> (i32, i32, i32) {
    %c0_i32 = arith.constant 0 : i32
    %c0_i32_0 = arith.constant 0 : i32
    %c0_i32_1 = arith.constant 0 : i32
    %c0_i32_2 = arith.constant 0 : i32
    return %c0_i32, %c0_i32_0, %c0_i32_1 : i32, i32, i32
  }
  func.func @transform_3(%arg0: i32) -> (i32, i32, i32) {
    %c0_i32 = arith.constant 0 : i32
    %c0_i32_0 = arith.constant 0 : i32
    %c0_i32_1 = arith.constant 0 : i32
    %c0_i32_2 = arith.constant 0 : i32
    return %c0_i32, %c0_i32_0, %c0_i32_1 : i32, i32, i32
  }
  func.func @transform_4(%arg0: i32) -> (i32, i32, i32) {
    %c0_i32 = arith.constant 0 : i32
    %c0_i32_0 = arith.constant 0 : i32
    %c0_i32_1 = arith.constant 0 : i32
    return %arg0, %c0_i32, %c0_i32_0 : i32, i32, i32
  }
}

</mosaic_0001>

<bundles_post_ra>
// kernel: tpu_custom_call.1
= control target key start
LH: loop header
LB: loop body
LE: loop exit
PB: predicated region body
PF: predicated region fallthrough
CT: control target
= control target key end

     0   :  { %9 = vsyncpa [#allocation3], 0  ;;  %s2525_s0 = inlined_call_operand.hbm [shape: f32[2,32,128], index: 0, kind: input, shape index: {}, may-alias: {0,4}]   ;;  %s2526_s1 = inlined_call_operand.vmem [shape: f32[2,24,32], index: 1, kind: input, shape index: {}]   ;;  %s2527_s2 = inlined_call_operand.vmem [shape: f32[2,64,8], index: 2, kind: input, shape index: {}]   ;;  %s2528_s3 = inlined_call_operand.vmem [shape: f32[2,64,8], index: 3, kind: input, shape index: {}]   ;;  %s2529_s4 = inlined_call_operand.hbm [shape: f32[2,32,128], index: 4, kind: output, shape index: {}, may-alias: {0,4}]  }
   0x1   :  { %11 = vsyncpa [#allocation3 + $0x1], 0 }
   0x2   :  { %12 = vsyncpa [#allocation4], 0 }
   0x3   :  { %14 = vsyncpa [#allocation4 + $0x1], 0  ;;  %s1962_s15 = smov 0   ;;  %s1964_s16 = smov 0  }
   0x4   :  { %s1966_s17 = smov 0   ;;  %s1968_s18 = smov 0  }
   0x5 LB: > { %s1983_s19 = sadd.s32 4294967295, %s1915_s18   ;;  %s1501_s20 = sadd.s32 4294967294, %s1915_s18   ;;  %s1915_s18 = sphi %s1968_s18, %s2542_s18   ;;  %s1911_s17 = sphi %s1966_s17, %s2541_s17   ;;  %s1907_s16 = sphi %s1964_s16, %s2540_s16   ;;  %s1903_s15 = sphi %s1962_s15, %s2539_s15  }
   0x6   : > { %s1987_s21 = sadd.s32 1, %s1915_s18   ;;  %s27_s22 = sadd.s32 1, %s1911_s17 }
   0x7   : > { %s24_s23 = ssub.s32 %s1915_s18, %s1987_s21  ;;  %p34_p0 = scmp.ne.s32.totalorder %s1911_s17, %s1907_s16 }
   0x8   : > { %p25_p1 = scmp.eq.s32.totalorder %s24_s23, 0  ;;  %p35_p2 = scmp.eq.s32.totalorder %s1915_s18, 0 }
   0x9   : > { %p40_p3 = scmp.ne.s32.totalorder %s1907_s16, %s1903_s15  ;;  %p41_p4 = scmp.eq.s32.totalorder %s1983_s19, 0 }
   0xa   : > { %s1999_s24 = scalar_select %p25_p1, %s1911_s17, %s27_s22  }
   0xb   : > { %p2001_p5 = por %p35_p2, %p34_p0  ;;  %p2005_p6 = por %p41_p4, %p40_p3 }
   0xc   : > { %p127_p7 = scmp.eq.s32.totalorder %s1983_s19, 1  ;;  %p133_p8 = scmp.eq.s32.totalorder %s1501_s20, 1 }
   0xd   : > { %p1693_p10 = scmp.lt.s32.totalorder %s1915_s18, 2  ;;  %s162_s29 = sand.u32 1, %s1911_s17  }
   0xe   : > { %p2012_p11 = por %p127_p7, %p34_p0  ;;  %p2016_p12 = por %p133_p8, %p40_p3 }
   0xf   : > { %s1573_s30 = sshll.u32 %s1915_s18, 9  ;;  %s1504_s5 = sshll.u32 %s162_s29, 5 }
  0x10   : > { %s2533_s27 = scalar_select %p2012_p11, 1, 0 }
  0x11   : > { %s2534_s28 = scalar_select %p2016_p12, 1, 0 }
  0x12   : > { %s2025_s8 = scalar_lea.hbm %s2525_s0, %s1573_s30  ;;  %s166_s9 = scalar_lea.vmem [#allocation2], %s1504_s5 }
  0x13   : > { %s173_s10 = sshll.u32 %s166_s9, 4  ;;  %p2029_p13 = pnand %p1693_p10, %p2001_p5  ;;  %s2033_s10 = int_to_ptr.vmem [resolvable:$true] %s173_s10 }
  0x14   : > { %s2035_s12 = scalar_lea.sflag [#allocation3], %s162_s29  ;;  %s1819_s13 = scalar_lea.hbm %s2025_s8, 512 }
  0x15   : > { %p1820_p0 = scmp.ne.s32.totalorder %s2025_s8, %s1819_s13  ;;  %p1821_p1 = pneg %p2029_p13 }
  0x16   : > { %s1824_s22 = scalar_lea.hbm %s2525_s0, 1024  ;;  %p1825_p4 = scmp.lt.u32.totalorder %s2025_s8, %s2525_s0 }
  0x17   : > { %p1822_p2 = pnand %p1821_p1, %p1820_p0  ;;  %p1826_p5 = scmp.lt.u32.totalorder %s1824_s22, %s1819_s13 }
  0x18   : > { %p1828_p8 = scmp.lt.u32.totalorder %s1819_s13, %s2025_s8 }
  0x19   : > { %p1823_p3 = pneg %p1822_p2  ;;  %p1827_p7 = por %p1826_p5, %p1825_p4 }
  0x1b   : > { %p1829_p10 = por %p1828_p8, %p1827_p7 }
  0x1d   : > { %p1830_p9 = pnand %p1829_p10, %p1823_p3 }
  0x1f   : > { %1833 = shalt.err (!%p1830_p9)
}
  0x20   : > { %s1834_s29 = scalar_lea.vmem %s2033_s10, 512  ;;  %s1917_s30 = smov [#allocation2]  }
  0x21   : > { %p1835_p0 = scmp.ne.s32.totalorder %s2033_s10, %s1834_s29  ;;  %s1839_s5 = sshll.u32 %s1917_s30, 4  ;;  %s1840_s5 = int_to_ptr.vmem [resolvable:$false] %s1839_s5 }
  0x22   : > { %s1841_s6 = scalar_lea.vmem %s1840_s5, 1024  ;;  %p1842_p11 = scmp.lt.s32.totalorder %s2033_s10, %s1840_s5 }
  0x23   : > { %p1837_p2 = pnand %p1835_p0, %p1821_p1  ;;  %p1843_p4 = scmp.lt.s32.totalorder %s1841_s6, %s1834_s29 }
  0x25   : > { %p1838_p12 = pneg %p1837_p2  ;;  %p1844_p5 = por %p1843_p4, %p1842_p11 }
  0x27   : > { %p1845_p7 = pnand %p1844_p5, %p1838_p12 }
  0x29   : > { %1848 = shalt.err (!%p1845_p7)
}
  0x2a   : > { %s1918_s7 = smov 128   ;;  %s1919_s9 = smov 8  }
  0x2b   : > { %1688 = dma.hbm_to_vmem [thread:$0]  (!%p2029_p13), %s2025_s8, 512, %s2033_s10, %s2035_s12, %s1918_s7, %s1918_s7, %s1919_s9  }
  0x2c   : > { %p1507_p9 = scmp.ge.s32.totalorder %s1915_s18, 1  ;;  %p181_p1 = scmp.lt.s32.totalorder %s1915_s18, 3 }
  0x2e   : > { %p182_p3 = pnand %p1507_p9, %p181_p1 }
  0x2f   : > { %s2066_s13 = sand.u32 (!%p182_p3), 1, %s1907_s16  }
  0x30   : > { %185 = sbr.rel (%p182_p3) target bundleno = 2806 (0xaf6), region = 36  ;;  %s1508_s14 = sshll.u32 (!%p182_p3), %s2066_s13, 5 }
  0x31   : > { %s188_s20 = scalar_lea.sflag (!%p182_p3), [#allocation3], %s2066_s13  ;;  %s191_s22 = scalar_lea.vmem (!%p182_p3), [#allocation2], %s1508_s14 }
  0x37   : > { %1894 = dma.done.wait (%p2005_p6), %s188_s20, 512  }
  0x38   : > { %1896 = vsyncadd (%p2005_p6), %s188_s20, 4294966784  ;;  %v1920_v0 = vmov 0.0|0.0   ;;  %vm1921_vm0 = vmmov 0   ;;  %v1922_v1 = vmov 0.0   ;;  %v1923_v2 = vmov 0   ;;  %v2080_v3 = vld [vmem:[%s191_s22] sm:$0xff] }
  0x39   : > { %1669 = vmatprep.subr.bf16.mxu0 %v1920_v0  ;;  %1615 = vmatprep.mubr.msk.f32.mxu0 %vm1921_vm0, %v1922_v1  ;;  %v2082_v4 = vld [vmem:[%s191_s22 + $0x8] sm:$0xff]  ;;  %v2084_v5 = vld [vmem:[%s191_s22 + $0x10] sm:$0xff]  ;;  %v2088_v7 = vld [vmem:[%s191_s22 + $0x18] sm:$0xff]  ;;  %vm225_vm1 = vcmask 261120   ;;  %s1924_s30 = smov 1   ;;  %s1925_s5 = smov 127   ;;  %v220_v19 = vlaneseq }
  0x3a   : > { %1745 = vset.pattern.permute.xlu0 %v1923_v2  ;;  %v1670_v6 = vpack.c.bf16 %v2082_v4, %v2080_v3  ;;  %v2093_v8 = vld [vmem:[%s2528_s3] sm:$0xff]  ;;  %v1673_v9 = vpack.c.bf16 %v2088_v7, %v2084_v5  ;;  %v223_v11 = vld [vmem:[%s2526_s1 + $0x8] sm:$0xff]  ;;  %v224_v12 = vld [vmem:[%s2526_s1 + $0x10] sm:$0xff]  ;;  %v1926_v33 = vmov 1   ;;  %v1927_v34 = vmov 2   ;;  %s1932_s11 = smov 2  }
  0x3b   : > { %338 = vperm.xlu0 %1745, %v2093_v8   ;;  %v222_v10 = vld [vmem:[%s2526_s1] sm:$0xff]  ;;  %v2115_v20 = vand.u32 127, %v220_v19  ;;  %1747 = vset.pattern.permute.xlu1 %v1927_v34  ;;  %vm444_vm4 = vcmask 64512   ;;  %v1928_v47 = vmov 3   ;;  %v2135_v48 = vld [vmem:[%s2528_s3 + $0x38] sm:$0xff]  ;;  %v2140_v49 = vld [vmem:[%s2528_s3 + $0x8] sm:$0xff] }
  0x3c   : > { %1671 = vmatpush3.bf16.msra.mxu0 %v1670_v6  ;;  %v396_v46 = vld [vmem:[%s2527_s2] sm:$0xff]  ;;  %v2147_v50 = vld [vmem:[%s2528_s3 + $0x10] sm:$0xff]  ;;  %v2153_v51 = vld [vmem:[%s2528_s3 + $0x18] sm:$0xff]  ;;  %s1933_s12 = smov 126   ;;  %s215_s23 = scalar_lea.vmem [#allocation5], %s1508_s14 }
  0x3d   : > { %1672 = vmatprep.subr.bf16.mxu0 %v1920_v0  ;;  %v317_v21 = vadd.s32 4294967295, %v2115_v20  ;;  %v327_v23 = vadd.s32 1, %v2115_v20  ;;  %1626 = vmatprep.mubr.msk.f32.mxu1 %vm444_vm4, %v396_v46  ;;  %v2159_v52 = vld [vmem:[%s2528_s3 + $0x20] sm:$0xff]  ;;  %v2165_v53 = vld [vmem:[%s2528_s3 + $0x28] sm:$0xff]  ;;  %v2171_v54 = vld [vmem:[%s2528_s3 + $0x30] sm:$0xff]  ;;  %s1428_s25 = sshll.u32 %s215_s23, 4  ;;  %s2473_s25 = int_to_ptr.vmem [resolvable:$true] %s1428_s25 }
  0x3e   : > { %s1574_s29 = sshll.u32 %s1983_s19, 9  ;;  %s1415_s19 = scalar_lea.sflag [#allocation4], %s2066_s13 }
  0x3f   : > { %vm318_vm2 = vcmp.ge.s32.totalorder %v317_v21, 0  ;;  %vm329_vm3 = vcmp.lt.s32.totalorder %v327_v23, 128  ;;  %1746 = vset.pattern.permute.xlu0 %v1926_v33  ;;  %s1849_s6 = scalar_lea.vmem %s2473_s25, 512  ;;  %p2536_p11 = scmp.ne.s32.totalorder %s2533_s27, 0 }
  0x40   : > { %1674 = vmatpush3.bf16.msra.mxu0 %v1673_v9  ;;  %v1513_v24 = vsel %vm318_vm2, 1.0, %v1922_v1  ;;  %v1514_v27 = vsel %vm329_vm3, 1.0, %v1922_v1  ;;  %p1850_p6 = scmp.ne.s32.totalorder %s2473_s25, %s1849_s6  ;;  %s1934_s7 = smov [#allocation5]  }
  0x41   : > { %s1853_s9 = sshll.u32 %s1934_s7, 4  ;;  %s1854_s9 = int_to_ptr.vmem [resolvable:$false] %s1853_s9 }
  0x42   : > { %p1851_p12 = pnand %p1850_p6, %p2536_p11  ;;  %s1855_s20 = scalar_lea.vmem %s1854_s9, 1024 }
  0x43   : > { %1616 = vmatmul.mubr.msk.f32.vlgmr.msra.gmra.mrb[0].mxu0 %vm225_vm1, %v222_v10  ;;  %p1856_p8 = scmp.lt.s32.totalorder %s2473_s25, %s1854_s9  ;;  %p1857_p10 = scmp.lt.s32.totalorder %s1855_s20, %s1849_s6 }
  0x44   : > { %1618 = vmatprep.mubr.msk.f32.mxu0 %vm1921_vm0, %v1922_v1  ;;  %p1852_p13 = pneg %p1851_p12 }
  0x45   : > { %p1858_p0 = por %p1857_p10, %p1856_p8 }
  0x47   : > { %1619 = vmatmul.mubr.msk.f32.gmra.mrb[2].mxu0 %vm225_vm1, %v223_v11  ;;  %p1859_p2 = pnand %p1858_p0, %p1852_p13 }
  0x48   : > { %1621 = vmatprep.mubr.msk.f32.mxu0 %vm1921_vm0, %v1922_v1 }
  0x4b   : > { %1622 = vmatmul.mubr.msk.f32.gmra.mrb[4].mxu0 %vm225_vm1, %v224_v12 }
  0xba   : > { %v339_v22 = vpop.permute.xlu0 %338 }
 0x116   : > { %v301_v13 = vpop.f32.mrb[0].mxu0 }
 0x117   : > { %315 = vrot.lane.b32.xlu0 %v301_v13, %s1924_s30  ;;  %v1617_v14 = vpop.f32.mrb[1].mxu0 }
 0x11a   : > { %v306_v15 = vpop.f32.mrb[2].mxu0 }
 0x11b   : > { %v1620_v16 = vpop.f32.mrb[3].mxu0 }
 0x11e   : > { %v311_v17 = vpop.f32.mrb[4].mxu0 }
 0x11f   : > { %325 = vrot.lane.b32.xlu1 %v311_v17, %s1925_s5  ;;  %v1623_v18 = vpop.f32.mrb[5].mxu0  ;;  %s2480_s5 = scalar_lea.hbm %s2529_s4, %s1574_s29 }
 0x189   : > { %v316_v25 = vpop.permute.xlu0 %315 }
 0x18a   : > { %v323_v26 = vmul.f32 %v1513_v24, %v316_v25  ;;  %v397_v25 = vld [vmem:[%s2527_s2 + $0x8] sm:$0xff] }
 0x18c   : > { %v324_v29 = vadd.f32 %v323_v26, %v306_v15  ;;  %v398_v26 = vld [vmem:[%s2527_s2 + $0x10] sm:$0xff] }
 0x191   : > { %v326_v28 = vpop.permute.xlu1 %325 }
 0x192   : > { %v333_v30 = vmul.f32 %v1514_v27, %v326_v28  ;;  %v399_v27 = vld [vmem:[%s2527_s2 + $0x18] sm:$0xff]  ;;  %v400_v28 = vld [vmem:[%s2527_s2 + $0x20] sm:$0xff] }
 0x194   : > { %v334_v31 = vadd.f32 %v333_v30, %v324_v29  ;;  %v401_v29 = vld [vmem:[%s2527_s2 + $0x28] sm:$0xff]  ;;  %v402_v30 = vld [vmem:[%s2527_s2 + $0x30] sm:$0xff] }
 0x196   : > { %v341_v32 = vadd.f32 %v339_v22, %v334_v31  ;;  %v403_v31 = vld [vmem:[%s2527_s2 + $0x38] sm:$0xff] }
 0x198   : > { %342 = vadd.xlane.f32.xlu1 %v341_v32 }
 0x1a9   : > { %375 = vperm.xlu1 %1747, %v2093_v8  }
 0x1ad   : > { %1748 = vset.pattern.permute.xlu1 %v1928_v47 }
 0x1ae   : > { %406 = vperm.xlu1 %1748, %v2093_v8  }
 0x1b2   : > { %411 = vperm.xlu1 %1748, %v2140_v49  }
 0x1b6   : > { %416 = vperm.xlu1 %1748, %v2147_v50  }
 0x1ba   : > { %421 = vperm.xlu1 %1748, %v2153_v51  }
 0x1be   : > { %426 = vperm.xlu1 %1748, %v2159_v52  }
 0x1c2   : > { %431 = vperm.xlu1 %1748, %v2165_v53  }
 0x1c6   : > { %436 = vperm.xlu1 %1748, %v2171_v54  }
 0x225   : > { %v343_v35 = vpop.xlane.xlu1 %342 }
 0x226   : > { %v345_v36 = vmul.f32 0.0078125, %v343_v35 }
 0x228   : > { %v346_v37 = vrot.slane %v345_v36, 4 }
 0x229   : > { %v376_v12 = vpop.permute.xlu1 %375 }
 0x22a   : > { %v347_v38 = vadd.f32 %v346_v37, %v345_v36 }
 0x22c   : > { %v348_v39 = vrot.slane %v347_v38, 2 }
 0x22e   : > { %v349_v40 = vadd.f32 %v348_v39, %v347_v38 }
 0x230   : > { %v350_v41 = vrot.slane %v349_v40, 1 }
 0x232   : > { %v351_v42 = vadd.f32 %v350_v41, %v349_v40 }
 0x234   : > { %v353_v43 = vmul.f32 0.125, %v351_v42 }
 0x236   : > { %v354_v44 = vsub.f32 %v341_v32, %v353_v43  ;;  %v407_v32 = vpop.permute.xlu1 %406 }
 0x238   : > { %v355_v45 = vmul.f32 %v354_v44, %v354_v44 }
 0x23a   : > { %356 = vadd.xlane.f32.xlu0 %v355_v45  ;;  %v412_v35 = vpop.permute.xlu1 %411 }
 0x23e   : > { %v417_v36 = vpop.permute.xlu1 %416 }
 0x242   : > { %v422_v37 = vpop.permute.xlu1 %421 }
 0x246   : > { %v427_v39 = vpop.permute.xlu1 %426 }
 0x250   : > { %370 = vperm.xlu0 %1746, %v2093_v8  }
 0x254   : > { %1749 = vset.pattern.permute.xlu0 %v1928_v47 }
 0x255   : > { %441 = vperm.xlu0 %1749, %v2135_v48  }
 0x2c7   : > { %v357_v55 = vpop.xlane.xlu0 %356 }
 0x2c8   : > { %v358_v56 = vmul.f32 0.0078125, %v357_v55  ;;  %v432_v55 = vpop.permute.xlu1 %431 }
 0x2ca   : > { %v359_v57 = vrot.slane %v358_v56, 4 }
 0x2cc   : > { %v360_v58 = vadd.f32 %v359_v57, %v358_v56 }
 0x2ce   : > { %v361_v59 = vrot.slane %v360_v58, 2 }
 0x2cf   : > { %v371_v10 = vpop.permute.xlu0 %370 }
 0x2d0   : > { %v362_v60 = vadd.f32 %v361_v59, %v360_v58 }
 0x2d2   : > { %v363_v61 = vrot.slane %v362_v60, 1 }
 0x2d4   : > { %v364_v62 = vadd.f32 %v363_v61, %v362_v60  ;;  %v442_v60 = vpop.permute.xlu0 %441 }
 0x2d6   : > { %v365_v63 = vmul.f32 0.125, %v364_v62  ;;  %v437_v62 = vpop.permute.xlu1 %436 }
 0x2d8   : > { %v366_v6 = vadd.f32 1e-05, %v365_v63 }
 0x2da   : > { %1775 = vrsqrt.f32 %v366_v6 }
 0x2e4   : > { %v1776_v9 = vpop.eup %1775 }
 0x2e5   : > { %v368_v11 = vmul.f32 %v1776_v9, %v354_v44 }
 0x2e7   : > { %v373_v13 = vmul.f32 %v371_v10, %v368_v11  ;;  %v1929_v10 = vmov 4  }
 0x2e8   : > { %1750 = vset.pattern.permute.xlu1 %v1929_v10  ;;  %1751 = vset.pattern.permute.xlu0 %v1929_v10 }
 0x2e9   : > { %v378_v14 = vadd.f32 %v376_v12, %v373_v13 }
 0x2eb   : > { %v380_v15 = vmul.f32 0.044715, %v378_v14  ;;  %v379_v22 = vmul.f32 0.5, %v378_v14 }
 0x2ed   : > { %v381_v16 = vmul.f32 %v380_v15, %v378_v14 }
 0x2ef   : > { %v382_v17 = vmul.f32 %v381_v16, %v378_v14 }
 0x2f1   : > { %v383_v18 = vadd.f32 %v382_v17, %v378_v14 }
 0x2f3   : > { %v384_v19 = vmul.f32 0.7978846, %v383_v18 }
 0x2f5   : > { %1777 = vtanh.f32 %v384_v19 }
 0x2ff   : > { %v1778_v21 = vpop.eup %1777 }
 0x300   : > { %v386_v23 = vadd.f32 1.0, %v1778_v21 }
 0x302   : > { %v387_v24 = vmul.f32 %v386_v23, %v379_v22 }
 0x304   : > { %1624 = vmatprep.subr.mxu1 %v387_v24 }
 0x305   : > { %1625 = vmatpush3.msra.mxu1 %v387_v24 }
 0x306   : > { %1627 = vmatmul.mubr.msk.f32.vlgmr.msra.gmra.mrb[0].mxu1 %vm444_vm4, %v397_v25  ;;  %1675 = vmatprep.subr.bf16.mxu1 %v1920_v0 }
 0x307   : > { %1629 = vmatprep.mubr.msk.f32.mxu1 %vm444_vm4, %v398_v26 }
 0x30a   : > { %1630 = vmatmul.mubr.msk.f32.gmra.mrb[2].mxu1 %vm444_vm4, %v399_v27 }
 0x30b   : > { %1632 = vmatprep.mubr.msk.f32.mxu1 %vm444_vm4, %v400_v28 }
 0x30e   : > { %1633 = vmatmul.mubr.msk.f32.gmra.mrb[4].mxu1 %vm444_vm4, %v401_v29 }
 0x30f   : > { %1635 = vmatprep.mubr.msk.f32.mxu1 %vm444_vm4, %v402_v30 }
 0x312   : > { %1636 = vmatmul.mubr.msk.f32.gmra.mrb[6].mxu1 %vm444_vm4, %v403_v31 }
 0x313   : > { %1646 = vmatprep.mubr.msk.f32.mxu1 %vm1921_vm0, %v1922_v1 }
 0x3d9   : > { %v1628_v38 = vpop.f32.mrb[0].mxu1 }
 0x3da   : > { %v541_v40 = vadd.f32 %v1628_v38, %v412_v35  ;;  %v535_v41 = vpop.f32.mrb[1].mxu1 }
 0x3db   : > { %v536_v42 = vadd.f32 %v535_v41, %v407_v32 }
 0x3dc   : > { %576 = vadd.xlane.f32.xlu0 %v541_v40 }
 0x3dd   : > { %v1631_v43 = vpop.f32.mrb[2].mxu1  ;;  %574 = vadd.xlane.f32.xlu1 %v536_v42 }
 0x3de   : > { %v551_v44 = vadd.f32 %v1631_v43, %v422_v37  ;;  %v545_v45 = vpop.f32.mrb[3].mxu1 }
 0x3df   : > { %v546_v46 = vadd.f32 %v545_v45, %v417_v36 }
 0x3e0   : > { %580 = vadd.xlane.f32.xlu0 %v551_v44 }
 0x3e1   : > { %v1634_v56 = vpop.f32.mrb[4].mxu1  ;;  %578 = vadd.xlane.f32.xlu1 %v546_v46 }
 0x3e2   : > { %v561_v57 = vadd.f32 %v1634_v56, %v432_v55  ;;  %v555_v58 = vpop.f32.mrb[5].mxu1 }
 0x3e3   : > { %v556_v59 = vadd.f32 %v555_v58, %v427_v39 }
 0x3e4   : > { %584 = vadd.xlane.f32.xlu0 %v561_v57 }
 0x3e5   : > { %v1637_v61 = vpop.f32.mrb[6].mxu1  ;;  %582 = vadd.xlane.f32.xlu1 %v556_v59 }
 0x3e6   : > { %v571_v63 = vadd.f32 %v1637_v61, %v442_v60  ;;  %v565_v6 = vpop.f32.mrb[7].mxu1 }
 0x3e7   : > { %v566_v9 = vadd.f32 %v565_v6, %v437_v62 }
 0x3e8   : > { %588 = vadd.xlane.f32.xlu0 %v571_v63 }
 0x3e9   : > { %586 = vadd.xlane.f32.xlu1 %v566_v9 }
 0x469   : > { %v577_v11 = vpop.xlane.xlu0 %576 }
 0x46a   : > { %v575_v12 = vpop.xlane.xlu1 %574  ;;  %v591_v13 = vmul.f32 0.0078125, %v577_v11 }
 0x46b   : > { %v590_v14 = vmul.f32 0.0078125, %v575_v12 }
 0x46d   : > { %v581_v15 = vpop.xlane.xlu0 %580  ;;  %v598_v17 = vadd.f32 %v591_v13, %v590_v14 }
 0x46e   : > { %v579_v16 = vpop.xlane.xlu1 %578  ;;  %v593_v19 = vmul.f32 0.0078125, %v581_v15  ;;  %v1930_v15 = vmov 5  }
 0x46f   : > { %v592_v18 = vmul.f32 0.0078125, %v579_v16 }
 0x471   : > { %v599_v21 = vadd.f32 %v598_v17, %v592_v18  ;;  %v585_v22 = vpop.xlane.xlu0 %584 }
 0x472   : > { %v583_v23 = vpop.xlane.xlu1 %582  ;;  %v595_v26 = vmul.f32 0.0078125, %v585_v22 }
 0x473   : > { %v600_v24 = vadd.f32 %v599_v21, %v593_v19  ;;  %v594_v25 = vmul.f32 0.0078125, %v583_v23 }
 0x475   : > { %v601_v27 = vadd.f32 %v600_v24, %v594_v25  ;;  %v589_v28 = vpop.xlane.xlu0 %588 }
 0x476   : > { %v587_v29 = vpop.xlane.xlu1 %586  ;;  %v597_v32 = vmul.f32 0.0078125, %v589_v28 }
 0x477   : > { %v602_v30 = vadd.f32 %v601_v27, %v595_v26  ;;  %v596_v31 = vmul.f32 0.0078125, %v587_v29 }
 0x479   : > { %v603_v35 = vadd.f32 %v602_v30, %v596_v31 }
 0x47b   : > { %v604_v36 = vadd.f32 %v603_v35, %v597_v32 }
 0x47d   : > { %v605_v37 = vrot.slane %v604_v36, 4 }
 0x47f   : > { %v606_v38 = vadd.f32 %v605_v37, %v604_v36 }
 0x481   : > { %v607_v39 = vrot.slane %v606_v38, 2 }
 0x483   : > { %v608_v41 = vadd.f32 %v607_v39, %v606_v38 }
 0x485   : > { %v609_v43 = vrot.slane %v608_v41, 1 }
 0x487   : > { %v610_v45 = vadd.f32 %v609_v43, %v608_v41 }
 0x489   : > { %v612_v55 = vmul.f32 0.015625, %v610_v45 }
 0x48b   : > { %v2207_v56 = vsub.f32 %v541_v40, %v612_v55  ;;  %v2209_v58 = vsub.f32 %v536_v42, %v612_v55  ;;  %v2215_v62 = vsub.f32 %v551_v44, %v612_v55  ;;  %v2217_v6 = vsub.f32 %v546_v46, %v612_v55 }
 0x48c   : > { %v2223_v42 = vsub.f32 %v561_v57, %v612_v55  ;;  %v2225_v12 = vsub.f32 %v556_v59, %v612_v55  ;;  %v2231_v13 = vsub.f32 %v571_v63, %v612_v55  ;;  %v2233_v14 = vsub.f32 %v566_v9, %v612_v55 }
 0x48d   : > { %v622_v60 = vmul.f32 %v2207_v56, %v2207_v56  ;;  %v621_v61 = vmul.f32 %v2209_v58, %v2209_v58  ;;  %v624_v11 = vmul.f32 %v2215_v62, %v2215_v62  ;;  %v623_v40 = vmul.f32 %v2217_v6, %v2217_v6 }
 0x48e   : > { %v626_v44 = vmul.f32 %v2223_v42, %v2223_v42  ;;  %v625_v46 = vmul.f32 %v2225_v12, %v2225_v12  ;;  %v628_v57 = vmul.f32 %v2231_v13, %v2231_v13  ;;  %v627_v59 = vmul.f32 %v2233_v14, %v2233_v14 }
 0x48f   : > { %631 = vadd.xlane.f32.xlu0 %v622_v60  ;;  %629 = vadd.xlane.f32.xlu1 %v621_v61 }
 0x493   : > { %635 = vadd.xlane.f32.xlu0 %v624_v11  ;;  %633 = vadd.xlane.f32.xlu1 %v623_v40 }
 0x497   : > { %639 = vadd.xlane.f32.xlu0 %v626_v44  ;;  %637 = vadd.xlane.f32.xlu1 %v625_v46 }
 0x49b   : > { %643 = vadd.xlane.f32.xlu0 %v628_v57  ;;  %641 = vadd.xlane.f32.xlu1 %v627_v59 }
 0x4ac   : > { %694 = vperm.xlu1 %1750, %v2159_v52  }
 0x4b0   : > { %1752 = vset.pattern.permute.xlu1 %v1930_v15 }
 0x4b1   : > { %734 = vperm.xlu1 %1752, %v2159_v52   ;;  %698 = vperm.xlu0 %1751, %v2165_v53   ;;  %v1931_v52 = vmov 6  }
 0x4b5   : > { %738 = vperm.xlu1 %1752, %v2165_v53   ;;  %682 = vperm.xlu0 %1751, %v2140_v49  }
 0x4b9   : > { %1753 = vset.pattern.permute.xlu1 %v1929_v10  ;;  %1757 = vset.pattern.permute.xlu0 %v1930_v15 }
 0x4ba   : > { %702 = vperm.xlu1 %1753, %v2171_v54   ;;  %722 = vperm.xlu0 %1757, %v2140_v49  }
 0x4be   : > { %706 = vperm.xlu1 %1753, %v2135_v48   ;;  %726 = vperm.xlu0 %1757, %v2147_v50  }
 0x4c2   : > { %1754 = vset.pattern.permute.xlu1 %v1930_v15  ;;  %1760 = vset.pattern.permute.xlu0 %v1931_v52 }
 0x4c3   : > { %742 = vperm.xlu1 %1754, %v2171_v54   ;;  %791 = vperm.xlu0 %1760, %v2093_v8  }
 0x4c7   : > { %746 = vperm.xlu1 %1754, %v2135_v48   ;;  %806 = vperm.xlu0 %1760, %v2153_v51  }
 0x4cb   : > { %1755 = vset.pattern.permute.xlu1 %v1929_v10  ;;  %1763 = vset.pattern.permute.xlu0 %v1926_v33 }
 0x4cc   : > { %678 = vperm.xlu1 %1755, %v2093_v8  }
 0x4d0   : > { %1756 = vset.pattern.permute.xlu1 %v1930_v15 }
 0x4d1   : > { %718 = vperm.xlu1 %1756, %v2093_v8   ;;  %v2274_v8 = vld [vmem:[%s2528_s3 + $0x40] sm:$0xff] }
 0x4d5   : > { %1758 = vset.pattern.permute.xlu1 %v1929_v10 }
 0x4d6   : > { %686 = vperm.xlu1 %1758, %v2147_v50  }
 0x4da   : > { %690 = vperm.xlu1 %1758, %v2153_v51  }
 0x4de   : > { %1759 = vset.pattern.permute.xlu1 %v1930_v15 }
 0x4df   : > { %730 = vperm.xlu1 %1759, %v2153_v51  }
 0x4e3   : > { %1761 = vset.pattern.permute.xlu1 %v1931_v52 }
 0x4e4   : > { %796 = vperm.xlu1 %1761, %v2140_v49  }
 0x4e8   : > { %801 = vperm.xlu1 %1761, %v2147_v50  }
 0x4ec   : > { %1762 = vset.pattern.permute.xlu1 %v1923_v2 }
 0x4ed   : > { %934 = vperm.xlu1 %1762, %v2274_v8  }
 0x4f1   : > { %1764 = vset.pattern.permute.xlu1 %v1927_v34 }
 0x51c   : > { %v632_v33 = vpop.xlane.xlu0 %631  ;;  %v630_v48 = vpop.xlane.xlu1 %629 }
 0x51d   : > { %v646_v51 = vmul.f32 0.0078125, %v632_v33  ;;  %v645_v53 = vmul.f32 0.0078125, %v630_v48 }
 0x51f   : > { %v653_v49 = vadd.f32 %v646_v51, %v645_v53 }
 0x520   : > { %v636_v54 = vpop.xlane.xlu0 %635  ;;  %v634_v63 = vpop.xlane.xlu1 %633 }
 0x521   : > { %v647_v9 = vmul.f32 0.0078125, %v634_v63  ;;  %v648_v50 = vmul.f32 0.0078125, %v636_v54 }
 0x523   : > { %v654_v16 = vadd.f32 %v653_v49, %v647_v9 }
 0x524   : > { %v640_v2 = vpop.xlane.xlu0 %639  ;;  %v638_v17 = vpop.xlane.xlu1 %637 }
 0x525   : > { %v655_v18 = vadd.f32 %v654_v16, %v648_v50  ;;  %v649_v19 = vmul.f32 0.0078125, %v638_v17  ;;  %v650_v21 = vmul.f32 0.0078125, %v640_v2 }
 0x527   : > { %v656_v22 = vadd.f32 %v655_v18, %v649_v19 }
 0x528   : > { %v644_v23 = vpop.xlane.xlu0 %643  ;;  %v642_v24 = vpop.xlane.xlu1 %641 }
 0x529   : > { %v657_v25 = vadd.f32 %v656_v22, %v650_v21  ;;  %v651_v34 = vmul.f32 0.0078125, %v642_v24  ;;  %v652_v26 = vmul.f32 0.0078125, %v644_v23 }
 0x52b   : > { %v658_v27 = vadd.f32 %v657_v25, %v651_v34 }
 0x52c   : > { %v695_v28 = vpop.permute.xlu1 %694 }
 0x52d   : > { %v659_v29 = vadd.f32 %v658_v27, %v652_v26 }
 0x52f   : > { %v660_v30 = vrot.slane %v659_v29, 4 }
 0x530   : > { %v735_v31 = vpop.permute.xlu1 %734  ;;  %v699_v59 = vpop.permute.xlu0 %698 }
 0x531   : > { %v661_v32 = vadd.f32 %v660_v30, %v659_v29 }
 0x533   : > { %v662_v35 = vrot.slane %v661_v32, 2 }
 0x534   : > { %v739_v36 = vpop.permute.xlu1 %738 }
 0x535   : > { %v663_v37 = vadd.f32 %v662_v35, %v661_v32 }
 0x537   : > { %v664_v38 = vrot.slane %v663_v37, 1 }
 0x539   : > { %v665_v39 = vadd.f32 %v664_v38, %v663_v37  ;;  %v703_v41 = vpop.permute.xlu1 %702 }
 0x53b   : > { %v666_v43 = vmul.f32 0.015625, %v665_v39 }
 0x53d   : > { %v667_v45 = vadd.f32 1e-05, %v666_v43  ;;  %v707_v55 = vpop.permute.xlu1 %706 }
 0x53f   : > { %1779 = vrsqrt.f32 %v667_v45 }
 0x542   : > { %v743_v60 = vpop.permute.xlu1 %742 }
 0x546   : > { %v747_v61 = vpop.permute.xlu1 %746 }
 0x549   : > { %v1780_v11 = vpop.eup %1779 }
 0x54a   : > { %v673_v40 = vmul.f32 %v1780_v11, %v2225_v12  ;;  %v675_v44 = vmul.f32 %v1780_v11, %v2233_v14  ;;  %v676_v46 = vmul.f32 %v1780_v11, %v2231_v13  ;;  %v674_v57 = vmul.f32 %v1780_v11, %v2223_v42  ;;  %v683_v13 = vpop.permute.xlu0 %682 }
 0x54b   : > { %v679_v33 = vpop.permute.xlu1 %678  ;;  %v670_v29 = vmul.f32 %v1780_v11, %v2207_v56  ;;  %v669_v30 = vmul.f32 %v1780_v11, %v2209_v58  ;;  %v671_v32 = vmul.f32 %v1780_v11, %v2217_v6 }
 0x54c   : > { %v713_v48 = vmul.f32 %v695_v28, %v673_v40  ;;  %v715_v51 = vmul.f32 %v703_v41, %v675_v44  ;;  %v716_v53 = vmul.f32 %v707_v55, %v676_v46  ;;  %v714_v54 = vmul.f32 %v699_v59, %v674_v57 }
 0x54d   : > { %v710_v37 = vmul.f32 %v683_v13, %v670_v29  ;;  %v709_v38 = vmul.f32 %v679_v33, %v669_v30  ;;  %v672_v41 = vmul.f32 %v1780_v11, %v2215_v62  ;;  %v922_v13 = vadd.s32 2, %v2115_v20 }
 0x54e   : > { %v753_v63 = vadd.f32 %v735_v31, %v713_v48  ;;  %v755_v49 = vadd.f32 %v743_v60, %v715_v51  ;;  %v754_v9 = vadd.f32 %v739_v36, %v714_v54  ;;  %v756_v50 = vadd.f32 %v747_v61, %v716_v53  ;;  %v723_v25 = vpop.permute.xlu0 %722 }
 0x54f   : > { %v750_v40 = vadd.f32 %v723_v25, %v710_v37  ;;  %vm924_vm6 = vcmp.lt.s32.totalorder %v922_v13, 128  ;;  %v1546_v13 = vld [vmem:[%s2527_s2 + $0x50] sm:$0xff] }
 0x550   : > { %v1523_v16 = vmul.f32 -1.442695, %v753_v63  ;;  %v1525_v2 = vmul.f32 -1.442695, %v755_v49  ;;  %v1524_v17 = vmul.f32 -1.442695, %v754_v9  ;;  %v719_v12 = vpop.permute.xlu1 %718 }
 0x551   : > { %v1526_v18 = vmul.f32 -1.442695, %v756_v50  ;;  %v749_v43 = vadd.f32 %v719_v12, %v709_v38 }
 0x552   : > { %1781 = vpow2.f32 %v1523_v16  ;;  %v727_v31 = vpop.permute.xlu0 %726 }
 0x553   : > { %1783 = vpow2.f32 %v1525_v2 }
 0x554   : > { %1785 = vpow2.f32 %v1524_v17 }
 0x555   : > { %1787 = vpow2.f32 %v1526_v18  ;;  %v687_v42 = vpop.permute.xlu1 %686 }
 0x556   : > { %v711_v35 = vmul.f32 %v687_v42, %v671_v32  ;;  %v792_v39 = vpop.permute.xlu0 %791  ;;  %v912_v42 = vadd.s32 4294967294, %v2115_v20 }
 0x558   : > { %v751_v55 = vadd.f32 %v727_v31, %v711_v35  ;;  %vm913_vm5 = vcmp.ge.s32.totalorder %v912_v42, 0  ;;  %v1545_v42 = vld [vmem:[%s2527_s2 + $0x48] sm:$0xff] }
 0x559   : > { %v691_v14 = vpop.permute.xlu1 %690 }
 0x55a   : > { %v712_v60 = vmul.f32 %v691_v14, %v672_v41  ;;  %v807_v51 = vpop.permute.xlu0 %806  ;;  %v1533_v14 = vsel %vm913_vm5, 1.0, %v1922_v1  ;;  %v2335_v41 = vld [vmem:[%s2528_s3 + $0x48] sm:$0xff] }
 0x55c   : > { %v1782_v19 = vpop.eup %1781 }
 0x55d   : > { %v1784_v21 = vpop.eup %1783  ;;  %v773_v22 = vadd.f32 1.0, %v1782_v19 }
 0x55e   : > { %v1786_v23 = vpop.eup %1785  ;;  %v775_v24 = vadd.f32 1.0, %v1784_v21  ;;  %v731_v28 = vpop.permute.xlu1 %730 }
 0x55f   : > { %v1788_v34 = vpop.eup %1787  ;;  %1789 = vrcp.f32 %v773_v22  ;;  %v774_v26 = vadd.f32 1.0, %v1786_v23  ;;  %v752_v46 = vadd.f32 %v731_v28, %v712_v60  ;;  %v1534_v23 = vsel %vm924_vm6, 1.0, %v1922_v1  ;;  %v2366_v60 = vld [vmem:[%s2528_s3 + $0x68] sm:$0xff] }
 0x560   : > { %1791 = vrcp.f32 %v775_v24  ;;  %v776_v27 = vadd.f32 1.0, %v1788_v34 }
 0x561   : > { %1793 = vrcp.f32 %v774_v26 }
 0x562   : > { %1795 = vrcp.f32 %v776_v27 }
 0x563   : > { %v797_v36 = vpop.permute.xlu1 %796 }
 0x567   : > { %v802_v57 = vpop.permute.xlu1 %801 }
 0x569   : > { %v1790_v45 = vpop.eup %1789 }
 0x56a   : > { %v1792_v61 = vpop.eup %1791  ;;  %v785_v44 = vmul.f32 %v1790_v45, %v749_v43  ;;  %v2341_v43 = vld [vmem:[%s2528_s3 + $0x50] sm:$0xff]  ;;  %v2353_v45 = vld [vmem:[%s2528_s3 + $0x58] sm:$0xff] }
 0x56b   : > { %v1794_v56 = vpop.eup %1793  ;;  %v787_v58 = vmul.f32 %v1792_v61, %v751_v55  ;;  %v2360_v55 = vld [vmem:[%s2528_s3 + $0x60] sm:$0xff]  ;;  %v2372_v61 = vld [vmem:[%s2528_s3 + $0x78] sm:$0xff] }
 0x56c   : > { %v1796_v59 = vpop.eup %1795  ;;  %v809_v6 = vmul.f32 %v792_v39, %v785_v44  ;;  %v786_v48 = vmul.f32 %v1794_v56, %v750_v40  ;;  %v935_v21 = vpop.permute.xlu1 %934  ;;  %v1544_v39 = vld [vmem:[%s2527_s2 + $0x40] sm:$0xff] }
 0x56d   : > { %v788_v53 = vmul.f32 %v1796_v59, %v752_v46  ;;  %v811_v11 = vmul.f32 %v802_v57, %v787_v58  ;;  %1657 = vmatprep.mubr.msk.f32.mxu0 %vm444_vm4, %v1544_v39 }
 0x56e   : > { %v2287_v33 = vadd.f32 %v809_v6, %v2080_v3  ;;  %v810_v62 = vmul.f32 %v797_v36, %v786_v48 }
 0x56f   : > { %v812_v54 = vmul.f32 %v807_v51, %v788_v53  ;;  %v2298_v50 = vadd.f32 %v811_v11, %v2084_v5  ;;  %v1528_v5 = vld [vmem:[%s2526_s1 + $0x20] sm:$0xff] }
 0x570   : > { %v2290_v63 = vadd.f32 %v810_v62, %v2082_v4  ;;  %v1527_v4 = vld [vmem:[%s2526_s1 + $0x18] sm:$0xff] }
 0x571   : > { %v2295_v9 = vadd.f32 %v812_v54, %v2088_v7 }
 0x572   : > { %v1676_v49 = vpack.c.bf16 %v2290_v63, %v2287_v33 }
 0x573   : > { %v1679_v3 = vpack.c.bf16 %v2295_v9, %v2298_v50 }
 0x574   : > { %1677 = vmatpush3.bf16.msra.mxu1 %v1676_v49 }
 0x575   : > { %1678 = vmatprep.subr.bf16.mxu1 %v1920_v0  ;;  %v1529_v0 = vld [vmem:[%s2526_s1 + $0x28] sm:$0xff] }
 0x578   : > { %1680 = vmatpush3.bf16.msra.mxu1 %v1679_v3 }
 0x57b   : > { %1647 = vmatmul.mubr.msk.f32.vlgmr.msra.gmra.mrb[8].mxu1 %vm225_vm1, %v1527_v4 }
 0x57c   : > { %1649 = vmatprep.mubr.msk.f32.mxu1 %vm1921_vm0, %v1922_v1 }
 0x57f   : > { %1650 = vmatmul.mubr.msk.f32.gmra.mrb[10].mxu1 %vm225_vm1, %v1528_v5 }
 0x580   : > { %1652 = vmatprep.mubr.msk.f32.mxu1 %vm1921_vm0, %v1922_v1 }
 0x583   : > { %1653 = vmatmul.mubr.msk.f32.gmra.mrb[12].mxu1 %vm225_vm1, %v1529_v0 }
 0x64e   : > { %v896_v7 = vpop.f32.mrb[8].mxu1 }
 0x64f   : > { %910 = vrot.lane.b32.xlu0 %v896_v7, %s1932_s11  ;;  %v1648_v16 = vpop.f32.mrb[9].mxu1 }
 0x652   : > { %v901_v2 = vpop.f32.mrb[10].mxu1 }
 0x653   : > { %v1651_v17 = vpop.f32.mrb[11].mxu1 }
 0x656   : > { %v906_v12 = vpop.f32.mrb[12].mxu1 }
 0x657   : > { %920 = vrot.lane.b32.xlu1 %v906_v12, %s1933_s12  ;;  %v1654_v18 = vpop.f32.mrb[13].mxu1 }
 0x6c1   : > { %v911_v19 = vpop.permute.xlu0 %910 }
 0x6c2   : > { %v918_v22 = vmul.f32 %v1533_v14, %v911_v19  ;;  %v1547_v14 = vld [vmem:[%s2527_s2 + $0x58] sm:$0xff]  ;;  %v1548_v19 = vld [vmem:[%s2527_s2 + $0x60] sm:$0xff] }
 0x6c4   : > { %v919_v25 = vadd.f32 %v918_v22, %v901_v2  ;;  %v1550_v22 = vld [vmem:[%s2527_s2 + $0x70] sm:$0xff] }
 0x6c9   : > { %v921_v24 = vpop.permute.xlu1 %920 }
 0x6ca   : > { %v928_v34 = vmul.f32 %v1534_v23, %v921_v24  ;;  %v1551_v23 = vld [vmem:[%s2527_s2 + $0x78] sm:$0xff] }
 0x6cc   : > { %v929_v26 = vadd.f32 %v928_v34, %v919_v25 }
 0x6ce   : > { %v937_v27 = vadd.f32 %v935_v21, %v929_v26  ;;  %v1549_v21 = vld [vmem:[%s2527_s2 + $0x68] sm:$0xff] }
 0x6d0   : > { %938 = vadd.xlane.f32.xlu0 %v937_v27 }
 0x6e6   : > { %964 = vperm.xlu0 %1763, %v2274_v8  }
 0x6ea   : > { %1766 = vset.pattern.permute.xlu0 %v1928_v47 }
 0x75d   : > { %v939_v28 = vpop.xlane.xlu0 %938 }
 0x75e   : > { %v940_v20 = vmul.f32 0.0078125, %v939_v28 }
 0x760   : > { %v941_v29 = vrot.slane %v940_v20, 4 }
 0x762   : > { %v942_v30 = vadd.f32 %v941_v29, %v940_v20 }
 0x764   : > { %v943_v31 = vrot.slane %v942_v30, 2 }
 0x765   : > { %v965_v62 = vpop.permute.xlu0 %964 }
 0x766   : > { %v944_v32 = vadd.f32 %v943_v31, %v942_v30 }
 0x768   : > { %v945_v35 = vrot.slane %v944_v32, 1 }
 0x76a   : > { %v946_v36 = vadd.f32 %v945_v35, %v944_v32 }
 0x76c   : > { %v947_v37 = vmul.f32 0.125, %v946_v36 }
 0x76e   : > { %v948_v1 = vsub.f32 %v937_v27, %v947_v37 }
 0x770   : > { %v949_v38 = vmul.f32 %v948_v1, %v948_v1 }
 0x772   : > { %950 = vadd.xlane.f32.xlu1 %v949_v38 }
 0x783   : > { %969 = vperm.xlu1 %1764, %v2274_v8  }
 0x787   : > { %1765 = vset.pattern.permute.xlu1 %v1928_v47  ;;  %v2346_v47 = vld [vmem:[%s2528_s3 + $0x70] sm:$0xff] }
 0x788   : > { %1001 = vperm.xlu1 %1765, %v2274_v8   ;;  %1031 = vperm.xlu0 %1766, %v2346_v47  }
 0x78c   : > { %1006 = vperm.xlu1 %1765, %v2335_v41   ;;  %1767 = vset.pattern.permute.xlu0 %v1929_v10 }
 0x790   : > { %1011 = vperm.xlu1 %1765, %v2341_v43  }
 0x794   : > { %1016 = vperm.xlu1 %1765, %v2353_v45  }
 0x798   : > { %1021 = vperm.xlu1 %1765, %v2360_v55  }
 0x79c   : > { %1026 = vperm.xlu1 %1765, %v2366_v60  }
 0x7a0   : > { %1036 = vperm.xlu1 %1765, %v2372_v61  }
 0x7a4   : > { %1768 = vset.pattern.permute.xlu1 %v1929_v10 }
 0x7ff   : > { %v951_v40 = vpop.xlane.xlu1 %950 }
 0x800   : > { %v952_v44 = vmul.f32 0.0078125, %v951_v40 }
 0x802   : > { %v953_v56 = vrot.slane %v952_v44, 4 }
 0x803   : > { %v970_v54 = vpop.permute.xlu1 %969 }
 0x804   : > { %v954_v46 = vadd.f32 %v953_v56, %v952_v44 }
 0x806   : > { %v955_v58 = vrot.slane %v954_v46, 2 }
 0x807   : > { %v1002_v24 = vpop.permute.xlu1 %1001  ;;  %v1032_v44 = vpop.permute.xlu0 %1031 }
 0x808   : > { %v956_v57 = vadd.f32 %v955_v58, %v954_v46 }
 0x80a   : > { %v957_v59 = vrot.slane %v956_v57, 1 }
 0x80b   : > { %v1007_v25 = vpop.permute.xlu1 %1006 }
 0x80c   : > { %v958_v6 = vadd.f32 %v957_v59, %v956_v57 }
 0x80e   : > { %v959_v48 = vmul.f32 0.125, %v958_v6 }
 0x80f   : > { %v1012_v34 = vpop.permute.xlu1 %1011 }
 0x810   : > { %v960_v51 = vadd.f32 1e-05, %v959_v48 }
 0x812   : > { %1797 = vrsqrt.f32 %v960_v51 }
 0x813   : > { %v1017_v26 = vpop.permute.xlu1 %1016 }
 0x817   : > { %v1022_v27 = vpop.permute.xlu1 %1021 }
 0x81b   : > { %v1027_v36 = vpop.permute.xlu1 %1026 }
 0x81c   : > { %v1798_v53 = vpop.eup %1797 }
 0x81d   : > { %v962_v11 = vmul.f32 %v1798_v53, %v948_v1 }
 0x81f   : > { %v967_v49 = vmul.f32 %v965_v62, %v962_v11  ;;  %v1037_v56 = vpop.permute.xlu1 %1036 }
 0x821   : > { %v972_v3 = vadd.f32 %v970_v54, %v967_v49 }
 0x823   : > { %v974_v4 = vmul.f32 0.044715, %v972_v3  ;;  %v973_v17 = vmul.f32 0.5, %v972_v3 }
 0x825   : > { %v975_v5 = vmul.f32 %v974_v4, %v972_v3 }
 0x827   : > { %v976_v0 = vmul.f32 %v975_v5, %v972_v3 }
 0x829   : > { %v977_v7 = vadd.f32 %v976_v0, %v972_v3 }
 0x82b   : > { %v978_v16 = vmul.f32 0.7978846, %v977_v7 }
 0x82d   : > { %1799 = vtanh.f32 %v978_v16 }
 0x837   : > { %v1800_v2 = vpop.eup %1799 }
 0x838   : > { %v980_v12 = vadd.f32 1.0, %v1800_v2 }
 0x83a   : > { %v981_v18 = vmul.f32 %v980_v12, %v973_v17 }
 0x83c   : > { %1655 = vmatprep.subr.mxu0 %v981_v18 }
 0x83d   : > { %1656 = vmatpush3.msra.mxu0 %v981_v18 }
 0x83e   : > { %1658 = vmatmul.mubr.msk.f32.vlgmr.msra.gmra.mrb[6].mxu0 %vm444_vm4, %v1545_v42 }
 0x83f   : > { %1660 = vmatprep.mubr.msk.f32.mxu0 %vm444_vm4, %v1546_v13 }
 0x842   : > { %1661 = vmatmul.mubr.msk.f32.gmra.mrb[8].mxu0 %vm444_vm4, %v1547_v14 }
 0x843   : > { %1663 = vmatprep.mubr.msk.f32.mxu0 %vm444_vm4, %v1548_v19 }
 0x846   : > { %1664 = vmatmul.mubr.msk.f32.gmra.mrb[10].mxu0 %vm444_vm4, %v1549_v21 }
 0x847   : > { %1666 = vmatprep.mubr.msk.f32.mxu0 %vm444_vm4, %v1550_v22 }
 0x84a   : > { %1667 = vmatmul.mubr.msk.f32.gmra.mrb[12].mxu0 %vm444_vm4, %v1551_v23 }
 0x911   : > { %v1659_v28 = vpop.f32.mrb[6].mxu0 }
 0x912   : > { %v1135_v20 = vadd.f32 %v1659_v28, %v1007_v25  ;;  %v1129_v29 = vpop.f32.mrb[7].mxu0 }
 0x913   : > { %v1130_v30 = vadd.f32 %v1129_v29, %v1002_v24 }
 0x914   : > { %1170 = vadd.xlane.f32.xlu0 %v1135_v20 }
 0x915   : > { %v1662_v31 = vpop.f32.mrb[8].mxu0  ;;  %1168 = vadd.xlane.f32.xlu1 %v1130_v30 }
 0x916   : > { %v1145_v32 = vadd.f32 %v1662_v31, %v1017_v26  ;;  %v1139_v35 = vpop.f32.mrb[9].mxu0 }
 0x917   : > { %v1140_v37 = vadd.f32 %v1139_v35, %v1012_v34 }
 0x919   : > { %v1665_v1 = vpop.f32.mrb[10].mxu0  ;;  %1172 = vadd.xlane.f32.xlu0 %v1140_v37  ;;  %1174 = vadd.xlane.f32.xlu1 %v1145_v32 }
 0x91a   : > { %v1155_v38 = vadd.f32 %v1665_v1, %v1027_v36  ;;  %v1149_v39 = vpop.f32.mrb[11].mxu0 }
 0x91b   : > { %v1150_v40 = vadd.f32 %v1149_v39, %v1022_v27 }
 0x91d   : > { %v1668_v46 = vpop.f32.mrb[12].mxu0  ;;  %1176 = vadd.xlane.f32.xlu0 %v1150_v40  ;;  %1178 = vadd.xlane.f32.xlu1 %v1155_v38 }
 0x91e   : > { %v2404_v58 = vadd.f32 %v1668_v46, %v1037_v56  ;;  %v1159_v57 = vpop.f32.mrb[13].mxu0 }
 0x91f   : > { %v1160_v59 = vadd.f32 %v1159_v57, %v1032_v44 }
 0x921   : > { %1180 = vadd.xlane.f32.xlu0 %v1160_v59  ;;  %1182 = vadd.xlane.f32.xlu1 %v2404_v58 }
 0x9a1   : > { %v1171_v6 = vpop.xlane.xlu0 %1170 }
 0x9a2   : > { %v1169_v48 = vpop.xlane.xlu1 %1168  ;;  %v1185_v51 = vmul.f32 0.0078125, %v1171_v6 }
 0x9a3   : > { %v1184_v53 = vmul.f32 0.0078125, %v1169_v48 }
 0x9a5   : > { %v1192_v54 = vadd.f32 %v1185_v51, %v1184_v53 }
 0x9a6   : > { %v1173_v62 = vpop.xlane.xlu0 %1172  ;;  %v1175_v11 = vpop.xlane.xlu1 %1174 }
 0x9a7   : > { %v1186_v49 = vmul.f32 0.0078125, %v1173_v62  ;;  %v1187_v4 = vmul.f32 0.0078125, %v1175_v11 }
 0x9a9   : > { %v1193_v3 = vadd.f32 %v1192_v54, %v1186_v49 }
 0x9aa   : > { %v1177_v5 = vpop.xlane.xlu0 %1176  ;;  %v1179_v0 = vpop.xlane.xlu1 %1178 }
 0x9ab   : > { %v1194_v7 = vadd.f32 %v1193_v3, %v1187_v4  ;;  %v1188_v16 = vmul.f32 0.0078125, %v1177_v5  ;;  %v1189_v17 = vmul.f32 0.0078125, %v1179_v0 }
 0x9ad   : > { %v1195_v2 = vadd.f32 %v1194_v7, %v1188_v16 }
 0x9ae   : > { %v1181_v12 = vpop.xlane.xlu0 %1180  ;;  %v1183_v18 = vpop.xlane.xlu1 %1182 }
 0x9af   : > { %v1196_v42 = vadd.f32 %v1195_v2, %v1189_v17  ;;  %v1190_v13 = vmul.f32 0.0078125, %v1181_v12  ;;  %v1191_v19 = vmul.f32 0.0078125, %v1183_v18 }
 0x9b1   : > { %v1197_v14 = vadd.f32 %v1196_v42, %v1190_v13 }
 0x9b3   : > { %v1198_v21 = vadd.f32 %v1197_v14, %v1191_v19 }
 0x9b5   : > { %v1199_v22 = vrot.slane %v1198_v21, 4 }
 0x9b7   : > { %v1200_v23 = vadd.f32 %v1199_v22, %v1198_v21 }
 0x9b9   : > { %v1201_v24 = vrot.slane %v1200_v23, 2 }
 0x9bb   : > { %v1202_v25 = vadd.f32 %v1201_v24, %v1200_v23 }
 0x9bd   : > { %v1203_v34 = vrot.slane %v1202_v25, 1 }
 0x9bf   : > { %v1204_v26 = vadd.f32 %v1203_v34, %v1202_v25 }
 0x9c1   : > { %v1205_v27 = vmul.f32 0.015625, %v1204_v26 }
 0x9c3   : > { %v2407_v28 = vsub.f32 %v1135_v20, %v1205_v27  ;;  %v2409_v29 = vsub.f32 %v1130_v30, %v1205_v27  ;;  %v2415_v36 = vsub.f32 %v1145_v32, %v1205_v27  ;;  %v2417_v1 = vsub.f32 %v1140_v37, %v1205_v27 }
 0x9c4   : > { %v2423_v30 = vsub.f32 %v1155_v38, %v1205_v27  ;;  %v2425_v44 = vsub.f32 %v1150_v40, %v1205_v27  ;;  %v2431_v56 = vsub.f32 %v1160_v59, %v1205_v27  ;;  %v1213_v38 = vsub.f32 %v2404_v58, %v1205_v27 }
 0x9c5   : > { %v1215_v31 = vmul.f32 %v2407_v28, %v2407_v28  ;;  %v1214_v35 = vmul.f32 %v2409_v29, %v2409_v29  ;;  %v1217_v39 = vmul.f32 %v2415_v36, %v2415_v36  ;;  %v1216_v20 = vmul.f32 %v2417_v1, %v2417_v1 }
 0x9c6   : > { %v1219_v32 = vmul.f32 %v2423_v30, %v2423_v30  ;;  %v1218_v37 = vmul.f32 %v2425_v44, %v2425_v44  ;;  %v1220_v46 = vmul.f32 %v2431_v56, %v2431_v56  ;;  %v1221_v40 = vmul.f32 %v1213_v38, %v1213_v38 }
 0x9c7   : > { %1224 = vadd.xlane.f32.xlu1 %v1215_v31  ;;  %1222 = vadd.xlane.f32.xlu0 %v1214_v35 }
 0x9cb   : > { %1228 = vadd.xlane.f32.xlu1 %v1217_v39  ;;  %1226 = vadd.xlane.f32.xlu0 %v1216_v20 }
 0x9cf   : > { %1232 = vadd.xlane.f32.xlu1 %v1219_v32  ;;  %1230 = vadd.xlane.f32.xlu0 %v1218_v37 }
 0x9d3   : > { %1234 = vadd.xlane.f32.xlu0 %v1220_v46 }
 0x9e0   : > { %1291 = vperm.xlu1 %1768, %v2366_v60  }
 0x9e4   : > { %1295 = vperm.xlu1 %1768, %v2346_v47  }
 0x9e8   : > { %1299 = vperm.xlu1 %1768, %v2372_v61  }
 0x9e9   : > { %1287 = vperm.xlu0 %1767, %v2360_v55  }
 0x9ec   : > { %1769 = vset.pattern.permute.xlu1 %v1930_v15 }
 0x9ed   : > { %1327 = vperm.xlu1 %1769, %v2360_v55   ;;  %1271 = vperm.xlu0 %1767, %v2274_v8  }
 0x9f1   : > { %1279 = vperm.xlu0 %1767, %v2341_v43  }
 0x9f5   : > { %1771 = vset.pattern.permute.xlu0 %v1930_v15 }
 0x9f6   : > { %1311 = vperm.xlu0 %1771, %v2274_v8  }
 0x9fa   : > { %1323 = vperm.xlu0 %1771, %v2353_v45  }
 0x9fe   : > { %1774 = vset.pattern.permute.xlu0 %v1931_v52 }
 0x9ff   : > { %1389 = vperm.xlu0 %1774, %v2335_v41  }
 0xa11   : > { %1236 = vadd.xlane.f32.xlu1 %v1221_v40 }
 0xa22   : > { %1331 = vperm.xlu1 %1769, %v2366_v60  }
 0xa26   : > { %1335 = vperm.xlu1 %1769, %v2346_v47  }
 0xa2a   : > { %1339 = vperm.xlu1 %1769, %v2372_v61  }
 0xa2e   : > { %1770 = vset.pattern.permute.xlu1 %v1929_v10 }
 0xa2f   : > { %1275 = vperm.xlu1 %1770, %v2335_v41  }
 0xa33   : > { %1283 = vperm.xlu1 %1770, %v2353_v45  }
 0xa37   : > { %1772 = vset.pattern.permute.xlu1 %v1930_v15 }
 0xa38   : > { %1315 = vperm.xlu1 %1772, %v2335_v41  }
 0xa3c   : > { %1319 = vperm.xlu1 %1772, %v2341_v43  }
 0xa40   : > { %1773 = vset.pattern.permute.xlu1 %v1931_v52 }
 0xa41   : > { %1384 = vperm.xlu1 %1773, %v2274_v8  }
 0xa45   : > { %1394 = vperm.xlu1 %1773, %v2341_v43  }
 0xa49   : > { %1399 = vperm.xlu1 %1773, %v2353_v45  }
 0xa54   : > { %v1225_v47 = vpop.xlane.xlu1 %1224  ;;  %v1223_v55 = vpop.xlane.xlu0 %1222 }
 0xa55   : > { %v1239_v57 = vmul.f32 0.0078125, %v1225_v47  ;;  %v1238_v15 = vmul.f32 0.0078125, %v1223_v55 }
 0xa57   : > { %v1246_v41 = vadd.f32 %v1239_v57, %v1238_v15 }
 0xa58   : > { %v1229_v10 = vpop.xlane.xlu1 %1228  ;;  %v1227_v61 = vpop.xlane.xlu0 %1226 }
 0xa59   : > { %v1240_v59 = vmul.f32 0.0078125, %v1227_v61  ;;  %v1241_v52 = vmul.f32 0.0078125, %v1229_v10 }
 0xa5b   : > { %v1247_v48 = vadd.f32 %v1246_v41, %v1240_v59 }
 0xa5c   : > { %v1233_v60 = vpop.xlane.xlu1 %1232  ;;  %v1231_v51 = vpop.xlane.xlu0 %1230 }
 0xa5d   : > { %v1248_v53 = vadd.f32 %v1247_v48, %v1241_v52  ;;  %v1242_v8 = vmul.f32 0.0078125, %v1231_v51  ;;  %v1243_v45 = vmul.f32 0.0078125, %v1233_v60 }
 0xa5f   : > { %v1249_v43 = vadd.f32 %v1248_v53, %v1242_v8 }
 0xa60   : > { %v1292_v58 = vpop.permute.xlu1 %1291  ;;  %v1235_v11 = vpop.xlane.xlu0 %1234 }
 0xa61   : > { %v1250_v49 = vadd.f32 %v1249_v43, %v1243_v45  ;;  %v1244_v3 = vmul.f32 0.0078125, %v1235_v11 }
 0xa63   : > { %v1251_v5 = vadd.f32 %v1250_v49, %v1244_v3 }
 0xa64   : > { %v1296_v6 = vpop.permute.xlu1 %1295 }
 0xa68   : > { %v1300_v62 = vpop.permute.xlu1 %1299  ;;  %v1288_v27 = vpop.permute.xlu0 %1287 }
 0xa6c   : > { %v1328_v54 = vpop.permute.xlu1 %1327 }
 0xa9e   : > { %v1237_v4 = vpop.xlane.xlu1 %1236 }
 0xa9f   : > { %v1245_v0 = vmul.f32 0.0078125, %v1237_v4 }
 0xaa1   : > { %v1252_v7 = vadd.f32 %v1251_v5, %v1245_v0 }
 0xaa2   : > { %v1332_v14 = vpop.permute.xlu1 %1331 }
 0xaa3   : > { %v1253_v16 = vrot.slane %v1252_v7, 4 }
 0xaa5   : > { %v1254_v2 = vadd.f32 %v1253_v16, %v1252_v7 }
 0xaa6   : > { %v1336_v21 = vpop.permute.xlu1 %1335 }
 0xaa7   : > { %v1255_v17 = vrot.slane %v1254_v2, 2 }
 0xaa9   : > { %v1256_v12 = vadd.f32 %v1255_v17, %v1254_v2 }
 0xaaa   : > { %v1340_v22 = vpop.permute.xlu1 %1339 }
 0xaab   : > { %v1257_v18 = vrot.slane %v1256_v12, 1 }
 0xaad   : > { %v1258_v42 = vadd.f32 %v1257_v18, %v1256_v12 }
 0xaae   : > { %v1276_v31 = vpop.permute.xlu1 %1275 }
 0xaaf   : > { %v1259_v13 = vmul.f32 0.015625, %v1258_v42 }
 0xab1   : > { %v1260_v19 = vadd.f32 1e-05, %v1259_v13 }
 0xab3   : > { %1801 = vrsqrt.f32 %v1260_v19 }
 0xabd   : > { %v1802_v23 = vpop.eup %1801 }
 0xabe   : > { %v1267_v24 = vmul.f32 %v1802_v23, %v2423_v30  ;;  %v1268_v25 = vmul.f32 %v1802_v23, %v2431_v56  ;;  %v1269_v34 = vmul.f32 %v1802_v23, %v1213_v38  ;;  %v1266_v26 = vmul.f32 %v1802_v23, %v2425_v44  ;;  %v1284_v30 = vpop.permute.xlu1 %1283  ;;  %v1272_v56 = vpop.permute.xlu0 %1271 }
 0xabf   : > { %v1263_v8 = vmul.f32 %v1802_v23, %v2407_v28  ;;  %v1265_v11 = vmul.f32 %v1802_v23, %v2415_v36  ;;  %v1262_v45 = vmul.f32 %v1802_v23, %v2409_v29 }
 0xac0   : > { %v1307_v35 = vmul.f32 %v1292_v58, %v1267_v24  ;;  %v1308_v39 = vmul.f32 %v1296_v6, %v1268_v25  ;;  %v1309_v20 = vmul.f32 %v1300_v62, %v1269_v34  ;;  %v1306_v32 = vmul.f32 %v1288_v27, %v1266_v26 }
 0xac1   : > { %v1264_v62 = vmul.f32 %v1802_v23, %v2417_v1  ;;  %v1305_v4 = vmul.f32 %v1284_v30, %v1265_v11  ;;  %v1302_v5 = vmul.f32 %v1272_v56, %v1262_v45 }
 0xac2   : > { %v1347_v37 = vadd.f32 %v1332_v14, %v1307_v35  ;;  %v1348_v46 = vadd.f32 %v1336_v21, %v1308_v39  ;;  %v1349_v40 = vadd.f32 %v1340_v22, %v1309_v20  ;;  %v1346_v47 = vadd.f32 %v1328_v54, %v1306_v32  ;;  %v1316_v44 = vpop.permute.xlu1 %1315  ;;  %v1280_v38 = vpop.permute.xlu0 %1279 }
 0xac3   : > { %v1303_v54 = vmul.f32 %v1276_v31, %v1263_v8  ;;  %v1304_v49 = vmul.f32 %v1280_v38, %v1264_v62 }
 0xac4   : > { %v1565_v10 = vmul.f32 -1.442695, %v1347_v37  ;;  %v1566_v55 = vmul.f32 -1.442695, %v1348_v46  ;;  %v1567_v60 = vmul.f32 -1.442695, %v1349_v40 }
 0xac5   : > { %v1564_v61 = vmul.f32 -1.442695, %v1346_v47  ;;  %v1343_v7 = vadd.f32 %v1316_v44, %v1303_v54 }
 0xac6   : > { %1803 = vpow2.f32 %v1565_v10  ;;  %v1320_v59 = vpop.permute.xlu1 %1319  ;;  %v1312_v52 = vpop.permute.xlu0 %1311 }
 0xac7   : > { %1805 = vpow2.f32 %v1566_v55  ;;  %v1344_v2 = vadd.f32 %v1320_v59, %v1304_v49  ;;  %v1342_v42 = vadd.f32 %v1312_v52, %v1302_v5 }
 0xac8   : > { %1807 = vpow2.f32 %v1567_v60 }
 0xac9   : > { %1809 = vpow2.f32 %v1564_v61 }
 0xaca   : > { %v1385_v43 = vpop.permute.xlu1 %1384  ;;  %v1324_v3 = vpop.permute.xlu0 %1323 }
 0xacb   : > { %v1345_v1 = vadd.f32 %v1324_v3, %v1305_v4 }
 0xace   : > { %v1395_v0 = vpop.permute.xlu1 %1394  ;;  %v1390_v28 = vpop.permute.xlu0 %1389 }
 0xad0   : > { %v1804_v58 = vpop.eup %1803 }
 0xad1   : > { %v1806_v57 = vpop.eup %1805  ;;  %v1367_v15 = vadd.f32 1.0, %v1804_v58 }
 0xad2   : > { %v1808_v41 = vpop.eup %1807  ;;  %v1368_v6 = vadd.f32 1.0, %v1806_v57  ;;  %v1400_v22 = vpop.permute.xlu1 %1399 }
 0xad3   : > { %v1810_v48 = vpop.eup %1809  ;;  %1811 = vrcp.f32 %v1367_v15  ;;  %v1369_v51 = vadd.f32 1.0, %v1808_v41 }
 0xad4   : > { %1813 = vrcp.f32 %v1368_v6  ;;  %v1366_v53 = vadd.f32 1.0, %v1810_v48 }
 0xad5   : > { %1815 = vrcp.f32 %v1369_v51 }
 0xad6   : > { %1817 = vrcp.f32 %v1366_v53 }
 0xadd   : > { %v1812_v16 = vpop.eup %1811 }
 0xade   : > { %v1814_v17 = vpop.eup %1813  ;;  %v1379_v12 = vmul.f32 %v1812_v16, %v1343_v7 }
 0xadf   : > { %v1816_v18 = vpop.eup %1815  ;;  %v1380_v36 = vmul.f32 %v1814_v17, %v1344_v2 }
 0xae0   : > { %v1818_v13 = vpop.eup %1817  ;;  %v1381_v29 = vmul.f32 %v1816_v18, %v1345_v1  ;;  %v1403_v14 = vmul.f32 %v1390_v28, %v1379_v12 }
 0xae1   : > { %v1378_v19 = vmul.f32 %v1818_v13, %v1342_v42  ;;  %v1404_v21 = vmul.f32 %v1395_v0, %v1380_v36 }
 0xae2   : > { %v1405_v23 = vmul.f32 %v1400_v22, %v1381_v29  ;;  %v1407_v24 = vadd.f32 %v1403_v14, %v2290_v63 }
 0xae3   : > { %v1402_v25 = vmul.f32 %v1385_v43, %v1378_v19  ;;  %v1408_v34 = vadd.f32 %v1404_v21, %v2298_v50 }
 0xae4   : > { %v1409_v26 = vadd.f32 %v1405_v23, %v2295_v9  ;;  %1411 = vst [vmem:[%s215_s23 + $0x8] sm:$0xff] %v1407_v24 }
 0xae5   : > { %v1406_v27 = vadd.f32 %v1402_v25, %v2287_v33  ;;  %1412 = vst [vmem:[%s215_s23 + $0x10] sm:$0xff] %v1408_v34 }
 0xae6   : > { %1413 = vst [vmem:[%s215_s23 + $0x18] sm:$0xff] %v1409_v26 }
 0xae7   : > { %1410 = vst [vmem:[%s215_s23] sm:$0xff] %v1406_v27 }
 0xae8   : > { %1862 = shalt.err (!%p1859_p2)
}
 0xae9   : > { %s1863_s22 = scalar_lea.hbm %s2480_s5, 512  ;;  %s1867_s10 = scalar_lea.hbm %s2529_s4, 1024 }
 0xaea   : > { %p1864_p4 = scmp.ne.s32.totalorder %s2480_s5, %s1863_s22  ;;  %p1868_p9 = scmp.lt.u32.totalorder %s2480_s5, %s2529_s4 }
 0xaeb   : > { %p1869_p1 = scmp.lt.u32.totalorder %s1867_s10, %s1863_s22  ;;  %p1871_p6 = scmp.lt.u32.totalorder %s1863_s22, %s2480_s5 }
 0xaec   : > { %p1865_p5 = pnand %p1864_p4, %p2536_p11 }
 0xaed   : > { %p1870_p3 = por %p1869_p1, %p1868_p9 }
 0xaee   : > { %p1866_p7 = pneg %p1865_p5 }
 0xaef   : > { %p1872_p12 = por %p1871_p6, %p1870_p3 }
 0xaf1   : > { %p1873_p13 = pnand %p1872_p12, %p1866_p7 }
 0xaf3   : > { %1876 = shalt.err (!%p1873_p13)
}
 0xaf4   : > { %s1935_s23 = smov 128   ;;  %s1936_s29 = smov 8  }
 0xaf5   : > { %1683 = dma.vmem_to_hbm [thread:$0]  (%p2536_p11), %s2473_s25, 512, %s2480_s5, %s1415_s19, %s1935_s23, %s1935_s23, %s1936_s29  }
 0xaf6 PF: > { %s1443_s14 = sand.u32 1, %s1903_s15   ;;  %p2537_p8 = scmp.ne.s32.totalorder %s2534_s28, 0 }
 0xaf7   : > { %p2538_p10 = scmp.ge.s32.totalorder %s1915_s18, 2  ;;  %s1444_s30 = scalar_lea.sflag [#allocation4], %s1443_s14 }
 0xaf9   : > { %p1690_p0 = pnand %p2538_p10, %p2537_p8 }
 0xafb   : > { %1898 = dma.done.wait (!%p1690_p0), %s1444_s30, 512  }
 0xafc   : > { %1900 = vsyncadd (!%p1690_p0), %s1444_s30, 4294966784  ;;  %p17_p2 = scmp.ge.s32.totalorder %s1987_s21, 4   ;;  %s2539_s15 = smov %s1907_s16 }
 0xafd   : > { %s2540_s16 = smov %s1911_s17  ;;  %s2541_s17 = smov %s1999_s24 }
 0xafe   : > { %s2542_s18 = smov %s1987_s21  ;;  %19 = sbr.rel (!%p17_p2) target bundleno = 5 (0x5), region = 84 }
 0xb05   :  { %1449 = vsyncpa [#allocation3], 1 }
 0xb06   :  { %1451 = vsyncpa [#allocation3 + $0x1], 1 }
 0xb07   :  { %1452 = vsyncpa [#allocation4], 1 }
 0xb08   :  { %1454 = vsyncpa [#allocation4 + $0x1], 1 }

</bundles_post_ra>
